<compile_context>
chip_gen: v7x
topology: tpu7x:2x2x1
jax: 0.10.0
libtpu: 0.0.40
codegen_flags: <defaults>
</compile_context>

<pallas_src>
import jax
import jax.numpy as jnp
from jax.experimental import pallas as pl
from jax.experimental.pallas import tpu as pltpu

D_HID = 512


def example_code_kernel(x_ref, tgt_ref, b0_ref, b1_ref, w_hbm_ref,
                        loss_ref, wbuf, sem):
    # Kick off all three weight DMAs immediately; each layer waits only for
    # its own weight, so layer-i compute overlaps the DMAs of layers i+1..
    copies = [pltpu.make_async_copy(w_hbm_ref.at[i], wbuf.at[i], sem.at[i])
              for i in range(3)]
    for c in copies:
        c.start()

    def mm(a_f32, w_bf16):
        # bf16 x bf16 MXU matmul, f32 accumulation.
        return jnp.dot(a_f32.astype(jnp.bfloat16), w_bf16,
                       preferred_element_type=jnp.float32)

    x = x_ref[...]                                     # (B, D) f32

    # layer 0: x @ mm_param0 ; skip connection ; relu
    copies[0].wait()
    h = mm(x, wbuf[0])
    skip = h
    h = jnp.maximum(h, 0.0)

    # layer 1 (folded): (h @ mm_param1) @ lin0.W^T + lin0.b ; relu ; + skip
    copies[1].wait()
    h = mm(h, wbuf[1]) + b0_ref[...]
    h = jnp.maximum(h, 0.0) + skip

    # layer 2 (folded): (h @ mm_param2) @ lin1.W^T + lin1.b ; relu
    copies[2].wait()
    h = mm(h, wbuf[2]) + b1_ref[...]
    h = jnp.maximum(h, 0.0)

    # MSELoss(reduction='sum')
    d = h - tgt_ref[...]
    loss_ref[0, 0] = jnp.sum(d * d)


def prepare_params(params):
    """One-time (init-time) parameter preparation.

    Folds the two back-to-back matmul pairs, pre-transposes the Linear
    weights, casts the folded weights to bf16 and stacks them into a single
    (3, D, D) HBM slab.  Run once, NOT per forward call.
    """
    w0, w1, w2, lin0_w, lin0_b, lin1_w, lin1_b = params
    w1f = w1 @ lin0_w.T            # mm_param1 then lin0   (exact fold, f32)
    w2f = w2 @ lin1_w.T            # mm_param2 then lin1
    w_stack = jnp.stack([w0, w1f, w2f]).astype(jnp.bfloat16)   # (3, D, D)
    b0 = lin0_b.reshape(1, D_HID).astype(jnp.float32)
    b1 = lin1_b.reshape(1, D_HID).astype(jnp.float32)
    return w_stack, b0, b1


def example_code_forward(x, target, prep):
    """Fused forward pass on pre-prepared params. Returns {'loss': scalar}."""
    w_stack, b0, b1 = prep
    B = x.shape[0]
    vmem = pl.BlockSpec(memory_space=pltpu.MemorySpace.VMEM)

    flops = 3 * 2 * B * D_HID * D_HID
    bytes_accessed = (w_stack.size * 2                 # bf16 weights
                      + (x.size + target.size) * 4     # f32 activations
                      + (b0.size + b1.size) * 4 + 4)   # biases + scalar out

    loss = pl.pallas_call(
        example_code_kernel,
        out_shape=jax.ShapeDtypeStruct((1, 1), jnp.float32),
        in_specs=[vmem, vmem, vmem, vmem,
                  pl.BlockSpec(memory_space=pl.ANY)],   # weights stay in HBM
        out_specs=pl.BlockSpec(memory_space=pltpu.MemorySpace.SMEM),
        scratch_shapes=[pltpu.VMEM((3, D_HID, D_HID), jnp.bfloat16),
                        pltpu.SemaphoreType.DMA((3,))],
        cost_estimate=pl.CostEstimate(flops=flops, transcendentals=0,
                                      bytes_accessed=bytes_accessed),
        compiler_params=pltpu.CompilerParams(vmem_limit_bytes=32 * 1024 * 1024),
    )(x, target, b0, b1, w_stack)
    return {"loss": loss[0, 0]}


def reference_forward_f32(x, target, params):
    """Pure-JAX f32 reference of the original (unfolded) module."""
    w0, w1, w2, lin0_w, lin0_b, lin1_w, lin1_b = params
    h = x @ w0
    skip = h
    h = jax.nn.relu(h)
    h = h @ w1
    h = h @ lin0_w.T + lin0_b
    h = jax.nn.relu(h)
    h = h + skip
    h = h @ w2
    h = h @ lin1_w.T + lin1_b
    h = jax.nn.relu(h)
    return jnp.sum((h - target) ** 2)


def reference_forward_prepared(x, target, prep):
    """Pure-JAX reference at the kernel's precision (folded bf16 weights)."""
    w_stack, b0, b1 = prep

    def mm(a, w):
        return jnp.dot(a.astype(jnp.bfloat16), w,
                       preferred_element_type=jnp.float32)

    h = mm(x, w_stack[0])
    skip = h
    h = jax.nn.relu(h)
    h = mm(h, w_stack[1]) + b0
    h = jax.nn.relu(h) + skip
    h = mm(h, w_stack[2]) + b1
    h = jax.nn.relu(h)
    return jnp.sum((h - target) ** 2)


if __name__ == "__main__":
    key = jax.random.PRNGKey(0)
    kx, kt, k0, k1, k2, kl0w, kl0b, kl1w, kl1b = jax.random.split(key, 9)

    B = 8  # small batch; hidden size fixed by the module (d_hid = 512)
    x = jax.random.normal(kx, (B, D_HID), dtype=jnp.float32)
    target = jax.random.normal(kt, (B, D_HID), dtype=jnp.float32)

    # Parameters (deterministic synthetic init matching the module's shapes).
    w0 = jax.random.normal(k0, (D_HID, D_HID), dtype=jnp.float32)
    w1 = jax.random.normal(k1, (D_HID, D_HID), dtype=jnp.float32)
    w2 = jax.random.normal(k2, (D_HID, D_HID), dtype=jnp.float32)
    bound = 1.0 / jnp.sqrt(D_HID)
    lin0_w = jax.random.uniform(kl0w, (D_HID, D_HID), jnp.float32, -bound, bound)
    lin0_b = jax.random.uniform(kl0b, (D_HID,), jnp.float32, -bound, bound)
    lin1_w = jax.random.uniform(kl1w, (D_HID, D_HID), jnp.float32, -bound, bound)
    lin1_b = jax.random.uniform(kl1b, (D_HID,), jnp.float32, -bound, bound)
    params = (w0, w1, w2, lin0_w, lin0_b, lin1_w, lin1_b)

    # One-time init-time preparation (fold + transpose-hoist + bf16 cast).
    prep = prepare_params(params)

    out = example_code_forward(x, target, prep)
    loss = jax.block_until_ready(out["loss"])

    # (1) Tight check vs. a matched-precision (folded, bf16-weight) JAX ref.
    ref_p = jax.block_until_ready(reference_forward_prepared(x, target, prep))
    rel_p = abs(float(loss) - float(ref_p)) / max(abs(float(ref_p)), 1e-6)
    assert rel_p < 5e-3, f"mismatch vs prepared ref: pallas={loss} ref={ref_p}"

    # (2) Looser check vs. the full-f32 unfused module reference; the bf16
    #     weight cast is an intentional approximation (error cancels in the
    #     4096-element loss sum, measured rel err << 1%).
    ref_f = jax.block_until_ready(reference_forward_f32(x, target, params))
    rel_f = abs(float(loss) - float(ref_f)) / max(abs(float(ref_f)), 1e-6)
    assert rel_f < 5e-2, f"mismatch vs f32 ref: pallas={loss} ref={ref_f}"

    print("KERNEL_OK")
</pallas_src>

<mosaic_0001>
module attributes {stable_mosaic.version = 11 : i64} {
  func.func @example_code_kernel(%arg0: memref<8x512xf32, #tpu.memory_space<vmem>>, %arg1: memref<8x512xf32, #tpu.memory_space<vmem>>, %arg2: memref<1x512xf32, #tpu.memory_space<vmem>>, %arg3: memref<1x512xf32, #tpu.memory_space<vmem>>, %arg4: memref<3x512x512xbf16, #tpu.memory_space<any>>, %arg5: memref<1x1xf32, #tpu.memory_space<smem>>, %arg6: memref<3x512x512xbf16, #tpu.memory_space<vmem>>, %arg7: memref<3x!tpu.dma_semaphore, #tpu.memory_space<semaphore_mem>>) attributes {dimension_semantics = [], scalar_prefetch = 0 : i64, scratch_operands = 2 : i64, tpu.core_type = #tpu.core_type<tc>} {
    %c0_i32 = arith.constant 0 : i32
    %c0_i32_0 = arith.constant 0 : i32
    %c0_i32_1 = arith.constant 0 : i32
    %c0_i32_2 = arith.constant 0 : i32
    %c0_i32_3 = arith.constant 0 : i32
    %0 = tpu.memref_slice %arg4[%c0_i32, %c0_i32_2, %c0_i32_3] : memref<3x512x512xbf16, #tpu.memory_space<any>> -> memref<1x512x512xbf16, #tpu.memory_space<any>>
    %1 = tpu.memref_squeeze %0 : memref<1x512x512xbf16, #tpu.memory_space<any>> -> memref<512x512xbf16, #tpu.memory_space<any>>
    %c0_i32_4 = arith.constant 0 : i32
    %c0_i32_5 = arith.constant 0 : i32
    %2 = tpu.memref_slice %arg6[%c0_i32_0, %c0_i32_4, %c0_i32_5] : memref<3x512x512xbf16, #tpu.memory_space<vmem>> -> memref<1x512x512xbf16, #tpu.memory_space<vmem>>
    %3 = tpu.memref_squeeze %2 : memref<1x512x512xbf16, #tpu.memory_space<vmem>> -> memref<512x512xbf16, #tpu.memory_space<vmem>>
    %4 = tpu.memref_slice %arg7[%c0_i32_1] : memref<3x!tpu.dma_semaphore, #tpu.memory_space<semaphore_mem>> -> memref<1x!tpu.dma_semaphore, #tpu.memory_space<semaphore_mem>>
    %5 = tpu.memref_squeeze %4 : memref<1x!tpu.dma_semaphore, #tpu.memory_space<semaphore_mem>> -> memref<!tpu.dma_semaphore, #tpu.memory_space<semaphore_mem>>
    tpu.enqueue_dma source(%1 : memref<512x512xbf16, #tpu.memory_space<any>>) target(%3 : memref<512x512xbf16, #tpu.memory_space<vmem>>) target_semaphore(%5 : memref<!tpu.dma_semaphore, #tpu.memory_space<semaphore_mem>>)
    %c1_i32 = arith.constant 1 : i32
    %c1_i32_6 = arith.constant 1 : i32
    %c1_i32_7 = arith.constant 1 : i32
    %c0_i32_8 = arith.constant 0 : i32
    %c0_i32_9 = arith.constant 0 : i32
    %6 = tpu.memref_slice %arg4[%c1_i32, %c0_i32_8, %c0_i32_9] : memref<3x512x512xbf16, #tpu.memory_space<any>> -> memref<1x512x512xbf16, #tpu.memory_space<any>>
    %7 = tpu.memref_squeeze %6 : memref<1x512x512xbf16, #tpu.memory_space<any>> -> memref<512x512xbf16, #tpu.memory_space<any>>
    %c0_i32_10 = arith.constant 0 : i32
    %c0_i32_11 = arith.constant 0 : i32
    %8 = tpu.memref_slice %arg6[%c1_i32_6, %c0_i32_10, %c0_i32_11] : memref<3x512x512xbf16, #tpu.memory_space<vmem>> -> memref<1x512x512xbf16, #tpu.memory_space<vmem>>
    %9 = tpu.memref_squeeze %8 : memref<1x512x512xbf16, #tpu.memory_space<vmem>> -> memref<512x512xbf16, #tpu.memory_space<vmem>>
    %10 = tpu.memref_slice %arg7[%c1_i32_7] : memref<3x!tpu.dma_semaphore, #tpu.memory_space<semaphore_mem>> -> memref<1x!tpu.dma_semaphore, #tpu.memory_space<semaphore_mem>>
    %11 = tpu.memref_squeeze %10 : memref<1x!tpu.dma_semaphore, #tpu.memory_space<semaphore_mem>> -> memref<!tpu.dma_semaphore, #tpu.memory_space<semaphore_mem>>
    tpu.enqueue_dma source(%7 : memref<512x512xbf16, #tpu.memory_space<any>>) target(%9 : memref<512x512xbf16, #tpu.memory_space<vmem>>) target_semaphore(%11 : memref<!tpu.dma_semaphore, #tpu.memory_space<semaphore_mem>>)
    %c2_i32 = arith.constant 2 : i32
    %c2_i32_12 = arith.constant 2 : i32
    %c2_i32_13 = arith.constant 2 : i32
    %c0_i32_14 = arith.constant 0 : i32
    %c0_i32_15 = arith.constant 0 : i32
    %12 = tpu.memref_slice %arg4[%c2_i32, %c0_i32_14, %c0_i32_15] : memref<3x512x512xbf16, #tpu.memory_space<any>> -> memref<1x512x512xbf16, #tpu.memory_space<any>>
    %13 = tpu.memref_squeeze %12 : memref<1x512x512xbf16, #tpu.memory_space<any>> -> memref<512x512xbf16, #tpu.memory_space<any>>
    %c0_i32_16 = arith.constant 0 : i32
    %c0_i32_17 = arith.constant 0 : i32
    %14 = tpu.memref_slice %arg6[%c2_i32_12, %c0_i32_16, %c0_i32_17] : memref<3x512x512xbf16, #tpu.memory_space<vmem>> -> memref<1x512x512xbf16, #tpu.memory_space<vmem>>
    %15 = tpu.memref_squeeze %14 : memref<1x512x512xbf16, #tpu.memory_space<vmem>> -> memref<512x512xbf16, #tpu.memory_space<vmem>>
    %16 = tpu.memref_slice %arg7[%c2_i32_13] : memref<3x!tpu.dma_semaphore, #tpu.memory_space<semaphore_mem>> -> memref<1x!tpu.dma_semaphore, #tpu.memory_space<semaphore_mem>>
    %17 = tpu.memref_squeeze %16 : memref<1x!tpu.dma_semaphore, #tpu.memory_space<semaphore_mem>> -> memref<!tpu.dma_semaphore, #tpu.memory_space<semaphore_mem>>
    tpu.enqueue_dma source(%13 : memref<512x512xbf16, #tpu.memory_space<any>>) target(%15 : memref<512x512xbf16, #tpu.memory_space<vmem>>) target_semaphore(%17 : memref<!tpu.dma_semaphore, #tpu.memory_space<semaphore_mem>>)
    %c0 = arith.constant 0 : index
    %c0_18 = arith.constant 0 : index
    %18 = vector.load %arg0[%c0, %c0_18] : memref<8x512xf32, #tpu.memory_space<vmem>>, vector<8x512xf32>
    %c0_i32_19 = arith.constant 0 : i32
    %c0_i32_20 = arith.constant 0 : i32
    %c0_i32_21 = arith.constant 0 : i32
    %c0_i32_22 = arith.constant 0 : i32
    %c0_i32_23 = arith.constant 0 : i32
    %19 = tpu.memref_slice %arg4[%c0_i32_19, %c0_i32_22, %c0_i32_23] : memref<3x512x512xbf16, #tpu.memory_space<any>> -> memref<1x512x512xbf16, #tpu.memory_space<any>>
    %20 = tpu.memref_squeeze %19 : memref<1x512x512xbf16, #tpu.memory_space<any>> -> memref<512x512xbf16, #tpu.memory_space<any>>
    %c0_i32_24 = arith.constant 0 : i32
    %c0_i32_25 = arith.constant 0 : i32
    %21 = tpu.memref_slice %arg6[%c0_i32_20, %c0_i32_24, %c0_i32_25] : memref<3x512x512xbf16, #tpu.memory_space<vmem>> -> memref<1x512x512xbf16, #tpu.memory_space<vmem>>
    %22 = tpu.memref_squeeze %21 : memref<1x512x512xbf16, #tpu.memory_space<vmem>> -> memref<512x512xbf16, #tpu.memory_space<vmem>>
    %23 = tpu.memref_slice %arg7[%c0_i32_21] : memref<3x!tpu.dma_semaphore, #tpu.memory_space<semaphore_mem>> -> memref<1x!tpu.dma_semaphore, #tpu.memory_space<semaphore_mem>>
    %24 = tpu.memref_squeeze %23 : memref<1x!tpu.dma_semaphore, #tpu.memory_space<semaphore_mem>> -> memref<!tpu.dma_semaphore, #tpu.memory_space<semaphore_mem>>
    tpu.wait_dma2 semaphore(%24 : memref<!tpu.dma_semaphore, #tpu.memory_space<semaphore_mem>>) src(%20 : memref<512x512xbf16, #tpu.memory_space<any>>) dst(%22 : memref<512x512xbf16, #tpu.memory_space<vmem>>)
    %c0_26 = arith.constant 0 : index
    %c0_27 = arith.constant 0 : index
    %c0_28 = arith.constant 0 : index
    %25 = vector.load %arg6[%c0_26, %c0_27, %c0_28] : memref<3x512x512xbf16, #tpu.memory_space<vmem>>, vector<1x512x512xbf16>
    %26 = vector.shape_cast %25 : vector<1x512x512xbf16> to vector<512x512xbf16>
    %27 = arith.truncf %18 : vector<8x512xf32> to vector<8x512xbf16>
    %cst = arith.constant dense<0.000000e+00> : vector<8x512xf32>
    %28 = tpu.matmul %27, %26, %cst {dimension_numbers = #tpu.dot_dimension_numbers<[1], [0], [0], [1], [0, 0, 1, 1], [], []>} : vector<8x512xbf16>, vector<512x512xbf16>, vector<8x512xf32> -> vector<8x512xf32>
    %cst_29 = arith.constant 0.000000e+00 : f32
    %29 = vector.broadcast %cst_29 : f32 to vector<8x512xf32>
    %30 = arith.maximumf %28, %29 : vector<8x512xf32>
    %c1_i32_30 = arith.constant 1 : i32
    %c1_i32_31 = arith.constant 1 : i32
    %c1_i32_32 = arith.constant 1 : i32
    %c0_i32_33 = arith.constant 0 : i32
    %c0_i32_34 = arith.constant 0 : i32
    %31 = tpu.memref_slice %arg4[%c1_i32_30, %c0_i32_33, %c0_i32_34] : memref<3x512x512xbf16, #tpu.memory_space<any>> -> memref<1x512x512xbf16, #tpu.memory_space<any>>
    %32 = tpu.memref_squeeze %31 : memref<1x512x512xbf16, #tpu.memory_space<any>> -> memref<512x512xbf16, #tpu.memory_space<any>>
    %c0_i32_35 = arith.constant 0 : i32
    %c0_i32_36 = arith.constant 0 : i32
    %33 = tpu.memref_slice %arg6[%c1_i32_31, %c0_i32_35, %c0_i32_36] : memref<3x512x512xbf16, #tpu.memory_space<vmem>> -> memref<1x512x512xbf16, #tpu.memory_space<vmem>>
    %34 = tpu.memref_squeeze %33 : memref<1x512x512xbf16, #tpu.memory_space<vmem>> -> memref<512x512xbf16, #tpu.memory_space<vmem>>
    %35 = tpu.memref_slice %arg7[%c1_i32_32] : memref<3x!tpu.dma_semaphore, #tpu.memory_space<semaphore_mem>> -> memref<1x!tpu.dma_semaphore, #tpu.memory_space<semaphore_mem>>
    %36 = tpu.memref_squeeze %35 : memref<1x!tpu.dma_semaphore, #tpu.memory_space<semaphore_mem>> -> memref<!tpu.dma_semaphore, #tpu.memory_space<semaphore_mem>>
    tpu.wait_dma2 semaphore(%36 : memref<!tpu.dma_semaphore, #tpu.memory_space<semaphore_mem>>) src(%32 : memref<512x512xbf16, #tpu.memory_space<any>>) dst(%34 : memref<512x512xbf16, #tpu.memory_space<vmem>>)
    %c1 = arith.constant 1 : index
    %c0_37 = arith.constant 0 : index
    %c0_38 = arith.constant 0 : index
    %37 = vector.load %arg6[%c1, %c0_37, %c0_38] : memref<3x512x512xbf16, #tpu.memory_space<vmem>>, vector<1x512x512xbf16>
    %38 = vector.shape_cast %37 : vector<1x512x512xbf16> to vector<512x512xbf16>
    %39 = arith.truncf %30 : vector<8x512xf32> to vector<8x512xbf16>
    %cst_39 = arith.constant dense<0.000000e+00> : vector<8x512xf32>
    %40 = tpu.matmul %39, %38, %cst_39 {dimension_numbers = #tpu.dot_dimension_numbers<[1], [0], [0], [1], [0, 0, 1, 1], [], []>} : vector<8x512xbf16>, vector<512x512xbf16>, vector<8x512xf32> -> vector<8x512xf32>
    %c0_40 = arith.constant 0 : index
    %c0_41 = arith.constant 0 : index
    %41 = vector.load %arg2[%c0_40, %c0_41] : memref<1x512xf32, #tpu.memory_space<vmem>>, vector<1x512xf32>
    %42 = vector.broadcast %41 : vector<1x512xf32> to vector<8x512xf32>
    %43 = arith.addf %40, %42 : vector<8x512xf32>
    %cst_42 = arith.constant 0.000000e+00 : f32
    %44 = vector.broadcast %cst_42 : f32 to vector<8x512xf32>
    %45 = arith.maximumf %43, %44 : vector<8x512xf32>
    %46 = arith.addf %45, %28 : vector<8x512xf32>
    %c2_i32_43 = arith.constant 2 : i32
    %c2_i32_44 = arith.constant 2 : i32
    %c2_i32_45 = arith.constant 2 : i32
    %c0_i32_46 = arith.constant 0 : i32
    %c0_i32_47 = arith.constant 0 : i32
    %47 = tpu.memref_slice %arg4[%c2_i32_43, %c0_i32_46, %c0_i32_47] : memref<3x512x512xbf16, #tpu.memory_space<any>> -> memref<1x512x512xbf16, #tpu.memory_space<any>>
    %48 = tpu.memref_squeeze %47 : memref<1x512x512xbf16, #tpu.memory_space<any>> -> memref<512x512xbf16, #tpu.memory_space<any>>
    %c0_i32_48 = arith.constant 0 : i32
    %c0_i32_49 = arith.constant 0 : i32
    %49 = tpu.memref_slice %arg6[%c2_i32_44, %c0_i32_48, %c0_i32_49] : memref<3x512x512xbf16, #tpu.memory_space<vmem>> -> memref<1x512x512xbf16, #tpu.memory_space<vmem>>
    %50 = tpu.memref_squeeze %49 : memref<1x512x512xbf16, #tpu.memory_space<vmem>> -> memref<512x512xbf16, #tpu.memory_space<vmem>>
    %51 = tpu.memref_slice %arg7[%c2_i32_45] : memref<3x!tpu.dma_semaphore, #tpu.memory_space<semaphore_mem>> -> memref<1x!tpu.dma_semaphore, #tpu.memory_space<semaphore_mem>>
    %52 = tpu.memref_squeeze %51 : memref<1x!tpu.dma_semaphore, #tpu.memory_space<semaphore_mem>> -> memref<!tpu.dma_semaphore, #tpu.memory_space<semaphore_mem>>
    tpu.wait_dma2 semaphore(%52 : memref<!tpu.dma_semaphore, #tpu.memory_space<semaphore_mem>>) src(%48 : memref<512x512xbf16, #tpu.memory_space<any>>) dst(%50 : memref<512x512xbf16, #tpu.memory_space<vmem>>)
    %c2 = arith.constant 2 : index
    %c0_50 = arith.constant 0 : index
    %c0_51 = arith.constant 0 : index
    %53 = vector.load %arg6[%c2, %c0_50, %c0_51] : memref<3x512x512xbf16, #tpu.memory_space<vmem>>, vector<1x512x512xbf16>
    %54 = vector.shape_cast %53 : vector<1x512x512xbf16> to vector<512x512xbf16>
    %55 = arith.truncf %46 : vector<8x512xf32> to vector<8x512xbf16>
    %cst_52 = arith.constant dense<0.000000e+00> : vector<8x512xf32>
    %56 = tpu.matmul %55, %54, %cst_52 {dimension_numbers = #tpu.dot_dimension_numbers<[1], [0], [0], [1], [0, 0, 1, 1], [], []>} : vector<8x512xbf16>, vector<512x512xbf16>, vector<8x512xf32> -> vector<8x512xf32>
    %c0_53 = arith.constant 0 : index
    %c0_54 = arith.constant 0 : index
    %57 = vector.load %arg3[%c0_53, %c0_54] : memref<1x512xf32, #tpu.memory_space<vmem>>, vector<1x512xf32>
    %58 = vector.broadcast %57 : vector<1x512xf32> to vector<8x512xf32>
    %59 = arith.addf %56, %58 : vector<8x512xf32>
    %cst_55 = arith.constant 0.000000e+00 : f32
    %60 = vector.broadcast %cst_55 : f32 to vector<8x512xf32>
    %61 = arith.maximumf %59, %60 : vector<8x512xf32>
    %c0_56 = arith.constant 0 : index
    %c0_57 = arith.constant 0 : index
    %62 = vector.load %arg1[%c0_56, %c0_57] : memref<8x512xf32, #tpu.memory_space<vmem>>, vector<8x512xf32>
    %63 = arith.subf %61, %62 : vector<8x512xf32>
    %64 = arith.mulf %63, %63 : vector<8x512xf32>
    %65 = vector.shape_cast %64 : vector<8x512xf32> to vector<1x8x512xf32>
    %cst_58 = arith.constant dense<0.000000e+00> : vector<1xf32>
    %66 = vector.multi_reduction <add>, %65, %cst_58 [1, 2] : vector<1x8x512xf32> to vector<1xf32>
    %67 = vector.shape_cast %66 : vector<1xf32> to vector<1x1x1xf32>
    %68 = vector.extract %67[0, 0, 0] : f32 from vector<1x1x1xf32>
    %c0_59 = arith.constant 0 : index
    %c0_60 = arith.constant 0 : index
    %69 = memref.load %arg5[%c0_59, %c0_60] : memref<1x1xf32, #tpu.memory_space<smem>>
    memref.store %68, %arg5[%c0_59, %c0_60] : memref<1x1xf32, #tpu.memory_space<smem>>
    return
  }
}

</mosaic_0001>

<bundles_post_ra>
// kernel: tpu_custom_call.1
= control target key start
LH: loop header
LB: loop body
LE: loop exit
PB: predicated region body
PF: predicated region fallthrough
CT: control target
= control target key end

     0   :  { %10 = vsyncpa [#allocation5], 0  ;;  %s1594_s0 = inlined_call_operand.hbm [shape: f32[8,512], index: 0, kind: input, shape index: {}]   ;;  %s1595_s1 = inlined_call_operand.hbm [shape: f32[8,512], index: 1, kind: input, shape index: {}]   ;;  %s1596_s2 = inlined_call_operand.hbm [shape: f32[1,512], index: 2, kind: input, shape index: {}]   ;;  %s1597_s3 = inlined_call_operand.hbm [shape: f32[1,512], index: 3, kind: input, shape index: {}]   ;;  %s1598_s4 = inlined_call_operand.hbm [shape: bf16[3,512,512], index: 4, kind: input, shape index: {}]   ;;  %s1599_s5 = inlined_call_operand.hbm [shape: f32[1,1], index: 5, kind: output, shape index: {}]  }
   0x1   :  { %11 = vsyncpa [#allocation8], 0 }
   0x2   :  { %12 = vsyncpa [#allocation11], 0 }
   0x3   :  { %13 = vsyncpa [#allocation6], 0  ;;  %s1372_s18 = smov [#allocation7]   ;;  %s1373_s20 = smov [#allocation4]  }
   0x4   :  { %s30_s19 = sshll.u32 %s1372_s18, 4  ;;  %s20_s21 = sshll.u32 %s1373_s20, 4  ;;  %s31_s19 = int_to_ptr.vmem [resolvable:$true] %s30_s19  ;;  %s21_s21 = int_to_ptr.vmem [resolvable:$true] %s20_s21 }
   0x5   :  { %s1260_s24 = scalar_lea.hbm %s1595_s1, 512 }
   0x6   :  { %p1261_p0 = scmp.ne.s32.totalorder %s1595_s1, %s1260_s24  ;;  %p1264_p1 = scmp.lt.u32.totalorder %s1260_s24, %s1595_s1 }
   0x8   :  { %p1266_p2 = pnand %p1264_p1, %p1261_p0 }
   0xa   :  { %1269 = shalt.err (!%p1266_p2)
}
   0xb   :  { %s1270_s29 = scalar_lea.vmem %s31_s19, 512  ;;  %p1275_p4 = scmp.lt.s32.totalorder %s31_s19, %s31_s19 }
   0xc   :  { %p1271_p3 = scmp.ne.s32.totalorder %s31_s19, %s1270_s29  ;;  %p1276_p5 = scmp.lt.s32.totalorder %s1270_s29, %s1270_s29 }
   0xe   :  { %p1277_p6 = por %p1276_p5, %p1275_p4 }
  0x10   :  { %p1278_p7 = pnand %p1277_p6, %p1271_p3 }
  0x12   :  { %1281 = shalt.err (!%p1278_p7)
}
  0x13   :  { %33 = dma.hbm_to_vmem [thread:$0]  %s1595_s1, 512, %s31_s19, [#allocation8]  }
  0x14   :  { %s1282_s9 = scalar_lea.hbm %s1594_s0, 512 }
  0x15   :  { %p1283_p8 = scmp.ne.s32.totalorder %s1594_s0, %s1282_s9  ;;  %p1286_p9 = scmp.lt.u32.totalorder %s1282_s9, %s1594_s0 }
  0x17   :  { %p1288_p10 = pnand %p1286_p9, %p1283_p8 }
  0x19   :  { %1291 = shalt.err (!%p1288_p10)
}
  0x1a   :  { %s1292_s14 = scalar_lea.vmem %s21_s21, 512  ;;  %p1297_p12 = scmp.lt.s32.totalorder %s21_s21, %s21_s21 }
  0x1b   :  { %p1293_p11 = scmp.ne.s32.totalorder %s21_s21, %s1292_s14  ;;  %p1298_p13 = scmp.lt.s32.totalorder %s1292_s14, %s1292_s14 }
  0x1d   :  { %p1299_p0 = por %p1298_p13, %p1297_p12 }
  0x1f   :  { %p1300_p1 = pnand %p1299_p0, %p1293_p11 }
  0x21   :  { %1303 = shalt.err (!%p1300_p1)
}
  0x22   :  { %23 = dma.hbm_to_vmem [thread:$0]  %s1594_s0, 512, %s21_s21, [#allocation5]  }
  0x23   :  { %s1374_s16 = smov [#allocation9]   ;;  %s1375_s18 = smov [#allocation10]  }
  0x24   :  { %s40_s17 = sshll.u32 %s1374_s16, 4  ;;  %s50_s19 = sshll.u32 %s1375_s18, 4  ;;  %s41_s17 = int_to_ptr.vmem [resolvable:$true] %s40_s17  ;;  %s51_s19 = int_to_ptr.vmem [resolvable:$true] %s50_s19 }
  0x25   :  { %s1304_s23 = scalar_lea.hbm %s1596_s2, 64 }
  0x26   :  { %p1305_p2 = scmp.ne.s32.totalorder %s1596_s2, %s1304_s23  ;;  %p1308_p3 = scmp.lt.u32.totalorder %s1304_s23, %s1596_s2 }
  0x28   :  { %p1310_p4 = pnand %p1308_p3, %p1305_p2 }
  0x2a   :  { %1313 = shalt.err (!%p1310_p4)
}
  0x2b   :  { %s1314_s0 = scalar_lea.vmem %s41_s17, 64  ;;  %p1319_p6 = scmp.lt.s32.totalorder %s41_s17, %s41_s17 }
  0x2c   :  { %p1315_p5 = scmp.ne.s32.totalorder %s41_s17, %s1314_s0  ;;  %p1320_p7 = scmp.lt.s32.totalorder %s1314_s0, %s1314_s0 }
  0x2e   :  { %p1321_p8 = por %p1320_p7, %p1319_p6 }
  0x30   :  { %p1322_p9 = pnand %p1321_p8, %p1315_p5 }
  0x32   :  { %1325 = shalt.err (!%p1322_p9)
}
  0x33   :  { %43 = dma.hbm_to_vmem [thread:$0]  %s1596_s2, 64, %s41_s17, [#allocation8]  }
  0x34   :  { %s1326_s6 = scalar_lea.hbm %s1597_s3, 64 }
  0x35   :  { %p1327_p10 = scmp.ne.s32.totalorder %s1597_s3, %s1326_s6  ;;  %p1330_p11 = scmp.lt.u32.totalorder %s1326_s6, %s1597_s3 }
  0x37   :  { %p1332_p12 = pnand %p1330_p11, %p1327_p10 }
  0x39   :  { %1335 = shalt.err (!%p1332_p12)
}
  0x3a   :  { %s1336_s11 = scalar_lea.vmem %s51_s19, 64  ;;  %p1341_p0 = scmp.lt.s32.totalorder %s51_s19, %s51_s19 }
  0x3b   :  { %p1337_p13 = scmp.ne.s32.totalorder %s51_s19, %s1336_s11  ;;  %p1342_p1 = scmp.lt.s32.totalorder %s1336_s11, %s1336_s11 }
  0x3d   :  { %p1343_p2 = por %p1342_p1, %p1341_p0 }
  0x3f   :  { %p1344_p3 = pnand %p1343_p2, %p1337_p13 }
  0x41   :  { %1347 = shalt.err (!%p1344_p3)
}
  0x42   :  { %53 = dma.hbm_to_vmem [thread:$0]  %s1597_s3, 64, %s51_s19, [#allocation11]  }
  0x43   :  { %1358 = dma.done.wait [#allocation5], 512  }
  0x44   :  { %1359 = vsyncadd [#allocation5], 4294966784 }
  0x45   :  { %1360 = dma.done.wait [#allocation8], 576  }
  0x46   :  { %1361 = vsyncadd [#allocation8], 4294966720 }
  0x47   :  { %1362 = dma.done.wait [#allocation11], 64  }
  0x48   :  { %1363 = vsyncadd [#allocation11], 4294967232  ;;  %s70_s13 = sld [smem:[#allocation0]]   ;;  %s1376_s14 = smov 512  }
  0x49   :  { %82 = sst [smem:[#allocation14]] %s1376_s14  ;;  %s1377_s1 = smov 4  }
  0x4a   :  { %84 = sst [smem:[#allocation14 + $0x1]] %s1376_s14  ;;  %s1378_s15 = smov 64  }
  0x4b   :  { %86 = sst [smem:[#allocation14 + $0x2]] %s1377_s1  ;;  %s1379_s16 = smov [#allocation2]  }
  0x4c   :  { %88 = sst [smem:[#allocation14 + $0x3]] %s1378_s15  ;;  %s78_s3 = sshll.u32 %s1379_s16, 4  ;;  %s79_s3 = int_to_ptr.vmem [resolvable:$true] %s78_s3 }
  0x4d   :  { %96 = sst [smem:[#allocation14 + $0x7]] %s1378_s15  ;;  %s1380_s18 = smov 128  }
  0x4e   :  { %98 = sst [smem:[#allocation14 + $0x8]] %s1377_s1  ;;  %s1197_s17 = sshll.u32 %s70_s13, 26 }
  0x4f   :  { %90 = sst [smem:[#allocation14 + $0x4]] %s1380_s18  ;;  %s1477_s19 = sadd.s32 134217728, %s1197_s17 }
  0x50   :  { %s1381_s20 = smov 2   ;;  %s1382_s22 = smov 256  }
  0x51   :  { %92 = sst [smem:[#allocation14 + $0x5]] %s1381_s20  ;;  %s1383_s23 = smov [#allocation3]  }
  0x52   :  { %94 = sst [smem:[#allocation14 + $0x6]] %s1382_s22  ;;  %s1384_s24 = smov [#allocation13]  }
  0x53   :  { %100 = dma.general %s1598_s4, 16384, %s79_s3, %s1383_s23, %s1384_s24, [#allocation14], %s1477_s19, 0  }
  0x54   :  { %119 = sst [smem:[#allocation16]] %s1376_s14  ;;  %s1385_s27 = smov [#allocation2 + $0x400]  }
  0x55   :  { %121 = sst [smem:[#allocation16 + $0x1]] %s1376_s14  ;;  %s115_s0 = sshll.u32 %s1385_s27, 4  ;;  %s116_s0 = int_to_ptr.vmem [resolvable:$true] %s115_s0 }
  0x56   :  { %123 = sst [smem:[#allocation16 + $0x2]] %s1377_s1  ;;  %s101_s29 = scalar_lea.hbm %s1598_s4, 16384 }
  0x57   :  { %125 = sst [smem:[#allocation16 + $0x3]] %s1378_s15  ;;  %s1386_s30 = smov [#allocation3 + $0x1]  }
  0x58   :  { %127 = sst [smem:[#allocation16 + $0x4]] %s1380_s18  ;;  %s1387_s6 = smov [#allocation15]  }
  0x59   :  { %129 = sst [smem:[#allocation16 + $0x5]] %s1381_s20  ;;  %s1388_s7 = smov [#allocation2 + $0x800]  }
  0x5a   :  { %131 = sst [smem:[#allocation16 + $0x6]] %s1382_s22  ;;  %s152_s8 = sshll.u32 %s1388_s7, 4  ;;  %s153_s8 = int_to_ptr.vmem [resolvable:$true] %s152_s8 }
  0x5b   :  { %133 = sst [smem:[#allocation16 + $0x7]] %s1378_s15  ;;  %s138_s11 = scalar_lea.hbm %s1598_s4, 32768 }
  0x5c   :  { %135 = sst [smem:[#allocation16 + $0x8]] %s1377_s1  ;;  %s1389_s2 = smov [#allocation3 + $0x2]  }
  0x5d   :  { %137 = dma.general %s101_s29, 16384, %s116_s0, %s1386_s30, %s1387_s6, [#allocation16], %s1477_s19, 0  }
  0x5e   :  { %156 = sst [smem:[#allocation18]] %s1376_s14  ;;  %s1390_s12 = smov [#allocation17]  }
  0x5f   :  { %158 = sst [smem:[#allocation18 + $0x1]] %s1376_s14 }
  0x60   :  { %160 = sst [smem:[#allocation18 + $0x2]] %s1377_s1 }
  0x61   :  { %162 = sst [smem:[#allocation18 + $0x3]] %s1378_s15 }
  0x62   :  { %164 = sst [smem:[#allocation18 + $0x4]] %s1380_s18 }
  0x63   :  { %166 = sst [smem:[#allocation18 + $0x5]] %s1381_s20 }
  0x64   :  { %168 = sst [smem:[#allocation18 + $0x6]] %s1382_s22 }
  0x65   :  { %170 = sst [smem:[#allocation18 + $0x7]] %s1378_s15 }
  0x66   :  { %172 = sst [smem:[#allocation18 + $0x8]] %s1377_s1 }
  0x67   :  { %174 = dma.general %s138_s11, 16384, %s153_s8, %s1389_s2, %s1390_s12, [#allocation18], %s1477_s19, 0  }
  0x68   :  { %v1511_v0 = vld [vmem:[#allocation4] sm:$0xff]  ;;  %v176_v1 = vld [vmem:[#allocation4 + $0x8] sm:$0xff]  ;;  %v1513_v2 = vld [vmem:[#allocation4 + $0x10] sm:$0xff] }
  0x69   :  { %v1515_v3 = vld [vmem:[#allocation4 + $0x18] sm:$0xff] }
  0x6a   :  { %1364 = dma.done.wait [#allocation3], 16384 }
  0x6b   :  { %1365 = vsyncadd [#allocation3], 4294950912  ;;  %v312_v4 = vpack.c.bf16 %v176_v1, %v176_v1  ;;  %v184_v5 = vld [vmem:[#allocation2 + $0x8] sm:$0xff]  ;;  %v186_v6 = vld [vmem:[#allocation2 + $0x18] sm:$0xff] }
  0x6c   :  { %v183_v7 = vld [vmem:[#allocation2] sm:$0xff]  ;;  %315 = vmatprep.subr.bf16.mxu0 %v184_v5  ;;  %397 = vmatprep.subr.bf16.mxu1 %v186_v6  ;;  %v185_v8 = vld [vmem:[#allocation2 + $0x10] sm:$0xff]  ;;  %v188_v9 = vld [vmem:[#allocation2 + $0x28] sm:$0xff] }
  0x6d   :  { %347 = vmatprep.mubr.bf16.mxu0 %v312_v4  ;;  %429 = vmatprep.mubr.bf16.mxu1 %v312_v4  ;;  %v190_v10 = vld [vmem:[#allocation2 + $0x38] sm:$0xff]  ;;  %v187_v11 = vld [vmem:[#allocation2 + $0x20] sm:$0xff]  ;;  %v189_v12 = vld [vmem:[#allocation2 + $0x30] sm:$0xff] }
  0x6e   :  { %316 = vmatpush1.bf16.msra.mxu0 %v183_v7  ;;  %398 = vmatpush1.bf16.msra.mxu1 %v185_v8  ;;  %v192_v13 = vld [vmem:[#allocation2 + $0x48] sm:$0xff]  ;;  %v194_v14 = vld [vmem:[#allocation2 + $0x58] sm:$0xff]  ;;  %v191_v15 = vld [vmem:[#allocation2 + $0x40] sm:$0xff] }
  0x6f   :  { %317 = vmatprep.subr.bf16.mxu0 %v188_v9  ;;  %399 = vmatprep.subr.bf16.mxu1 %v190_v10  ;;  %v193_v16 = vld [vmem:[#allocation2 + $0x50] sm:$0xff]  ;;  %v196_v17 = vld [vmem:[#allocation2 + $0x68] sm:$0xff]  ;;  %v198_v18 = vld [vmem:[#allocation2 + $0x78] sm:$0xff]  ;;  %v311_v10 = vpack.c.bf16 %v1511_v0, %v1511_v0 }
  0x70   :  { %v195_v19 = vld [vmem:[#allocation2 + $0x60] sm:$0xff]  ;;  %v197_v20 = vld [vmem:[#allocation2 + $0x70] sm:$0xff]  ;;  %v200_v21 = vld [vmem:[#allocation2 + $0x88] sm:$0xff] }
  0x71   :  { %v202_v22 = vld [vmem:[#allocation2 + $0x98] sm:$0xff]  ;;  %v199_v23 = vld [vmem:[#allocation2 + $0x80] sm:$0xff]  ;;  %v201_v24 = vld [vmem:[#allocation2 + $0x90] sm:$0xff] }
  0x72   :  { %318 = vmatpush1.bf16.msra.mxu0 %v187_v11  ;;  %400 = vmatpush1.bf16.msra.mxu1 %v189_v12  ;;  %v204_v25 = vld [vmem:[#allocation2 + $0xa8] sm:$0xff]  ;;  %v206_v26 = vld [vmem:[#allocation2 + $0xb8] sm:$0xff]  ;;  %v203_v27 = vld [vmem:[#allocation2 + $0xa0] sm:$0xff] }
  0x73   :  { %319 = vmatprep.subr.bf16.mxu0 %v192_v13  ;;  %401 = vmatprep.subr.bf16.mxu1 %v194_v14  ;;  %v205_v28 = vld [vmem:[#allocation2 + $0xb0] sm:$0xff]  ;;  %v208_v29 = vld [vmem:[#allocation2 + $0xc8] sm:$0xff]  ;;  %v210_v30 = vld [vmem:[#allocation2 + $0xd8] sm:$0xff] }
  0x74   :  { %v207_v31 = vld [vmem:[#allocation2 + $0xc0] sm:$0xff]  ;;  %v209_v32 = vld [vmem:[#allocation2 + $0xd0] sm:$0xff]  ;;  %v212_v33 = vld [vmem:[#allocation2 + $0xe8] sm:$0xff] }
  0x75   :  { %v214_v34 = vld [vmem:[#allocation2 + $0xf8] sm:$0xff]  ;;  %v211_v35 = vld [vmem:[#allocation2 + $0xe0] sm:$0xff]  ;;  %v213_v36 = vld [vmem:[#allocation2 + $0xf0] sm:$0xff] }
  0x76   :  { %320 = vmatpush1.bf16.msra.mxu0 %v191_v15  ;;  %402 = vmatpush1.bf16.msra.mxu1 %v193_v16  ;;  %v216_v37 = vld [vmem:[#allocation2 + $0x108] sm:$0xff]  ;;  %v218_v38 = vld [vmem:[#allocation2 + $0x118] sm:$0xff]  ;;  %v215_v39 = vld [vmem:[#allocation2 + $0x100] sm:$0xff]  ;;  %v314_v15 = vpack.c.bf16 %v1515_v3, %v1515_v3 }
  0x77   :  { %321 = vmatprep.subr.bf16.mxu0 %v196_v17  ;;  %403 = vmatprep.subr.bf16.mxu1 %v198_v18  ;;  %v217_v40 = vld [vmem:[#allocation2 + $0x110] sm:$0xff]  ;;  %v220_v41 = vld [vmem:[#allocation2 + $0x128] sm:$0xff]  ;;  %v222_v42 = vld [vmem:[#allocation2 + $0x138] sm:$0xff] }
  0x78   :  { %v219_v43 = vld [vmem:[#allocation2 + $0x120] sm:$0xff]  ;;  %v221_v44 = vld [vmem:[#allocation2 + $0x130] sm:$0xff]  ;;  %v224_v45 = vld [vmem:[#allocation2 + $0x148] sm:$0xff] }
  0x79   :  { %v226_v46 = vld [vmem:[#allocation2 + $0x158] sm:$0xff]  ;;  %v223_v47 = vld [vmem:[#allocation2 + $0x140] sm:$0xff]  ;;  %v225_v48 = vld [vmem:[#allocation2 + $0x150] sm:$0xff] }
  0x7a   :  { %322 = vmatpush1.bf16.msra.mxu0 %v195_v19  ;;  %404 = vmatpush1.bf16.msra.mxu1 %v197_v20  ;;  %v228_v49 = vld [vmem:[#allocation2 + $0x168] sm:$0xff]  ;;  %v230_v50 = vld [vmem:[#allocation2 + $0x178] sm:$0xff]  ;;  %v227_v51 = vld [vmem:[#allocation2 + $0x160] sm:$0xff] }
  0x7b   :  { %323 = vmatprep.subr.bf16.mxu0 %v200_v21  ;;  %405 = vmatprep.subr.bf16.mxu1 %v202_v22  ;;  %v229_v52 = vld [vmem:[#allocation2 + $0x170] sm:$0xff]  ;;  %v232_v53 = vld [vmem:[#allocation2 + $0x188] sm:$0xff]  ;;  %v234_v54 = vld [vmem:[#allocation2 + $0x198] sm:$0xff] }
  0x7c   :  { %v231_v55 = vld [vmem:[#allocation2 + $0x180] sm:$0xff]  ;;  %v233_v56 = vld [vmem:[#allocation2 + $0x190] sm:$0xff]  ;;  %v236_v57 = vld [vmem:[#allocation2 + $0x1a8] sm:$0xff] }
  0x7d   :  { %v238_v58 = vld [vmem:[#allocation2 + $0x1b8] sm:$0xff]  ;;  %v235_v59 = vld [vmem:[#allocation2 + $0x1a0] sm:$0xff]  ;;  %v237_v60 = vld [vmem:[#allocation2 + $0x1b0] sm:$0xff] }
  0x7e   :  { %324 = vmatpush1.bf16.msra.mxu0 %v199_v23  ;;  %406 = vmatpush1.bf16.msra.mxu1 %v201_v24  ;;  %v240_v61 = vld [vmem:[#allocation2 + $0x1c8] sm:$0xff]  ;;  %v242_v62 = vld [vmem:[#allocation2 + $0x1d8] sm:$0xff]  ;;  %v239_v63 = vld [vmem:[#allocation2 + $0x1c0] sm:$0xff] }
  0x7f   :  { %325 = vmatprep.subr.bf16.mxu0 %v204_v25  ;;  %407 = vmatprep.subr.bf16.mxu1 %v206_v26  ;;  %v241_v1 = vld [vmem:[#allocation2 + $0x1d0] sm:$0xff]  ;;  %v244_v4 = vld [vmem:[#allocation2 + $0x1e8] sm:$0xff]  ;;  %v246_v5 = vld [vmem:[#allocation2 + $0x1f8] sm:$0xff] }
  0x80   :  { %v243_v6 = vld [vmem:[#allocation2 + $0x1e0] sm:$0xff]  ;;  %v245_v7 = vld [vmem:[#allocation2 + $0x1f0] sm:$0xff]  ;;  %v248_v8 = vld [vmem:[#allocation2 + $0x208] sm:$0xff] }
  0x81   :  { %v250_v9 = vld [vmem:[#allocation2 + $0x218] sm:$0xff]  ;;  %v247_v11 = vld [vmem:[#allocation2 + $0x200] sm:$0xff]  ;;  %v249_v12 = vld [vmem:[#allocation2 + $0x210] sm:$0xff] }
  0x82   :  { %326 = vmatpush1.bf16.msra.mxu0 %v203_v27  ;;  %408 = vmatpush1.bf16.msra.mxu1 %v205_v28  ;;  %v252_v13 = vld [vmem:[#allocation2 + $0x228] sm:$0xff]  ;;  %v254_v14 = vld [vmem:[#allocation2 + $0x238] sm:$0xff]  ;;  %v251_v16 = vld [vmem:[#allocation2 + $0x220] sm:$0xff] }
  0x83   :  { %327 = vmatprep.subr.bf16.mxu0 %v208_v29  ;;  %409 = vmatprep.subr.bf16.mxu1 %v210_v30  ;;  %v253_v17 = vld [vmem:[#allocation2 + $0x230] sm:$0xff]  ;;  %v256_v0 = vld [vmem:[#allocation2 + $0x248] sm:$0xff]  ;;  %v258_v18 = vld [vmem:[#allocation2 + $0x258] sm:$0xff] }
  0x84   :  { %v255_v19 = vld [vmem:[#allocation2 + $0x240] sm:$0xff]  ;;  %v257_v20 = vld [vmem:[#allocation2 + $0x250] sm:$0xff]  ;;  %v260_v21 = vld [vmem:[#allocation2 + $0x268] sm:$0xff] }
  0x85   :  { %v262_v3 = vld [vmem:[#allocation2 + $0x278] sm:$0xff]  ;;  %v259_v22 = vld [vmem:[#allocation2 + $0x260] sm:$0xff]  ;;  %v261_v23 = vld [vmem:[#allocation2 + $0x270] sm:$0xff] }
  0x86   :  { %328 = vmatpush1.bf16.msra.mxu0 %v207_v31  ;;  %410 = vmatpush1.bf16.msra.mxu1 %v209_v32  ;;  %v264_v24 = vld [vmem:[#allocation2 + $0x288] sm:$0xff]  ;;  %v266_v25 = vld [vmem:[#allocation2 + $0x298] sm:$0xff]  ;;  %v263_v26 = vld [vmem:[#allocation2 + $0x280] sm:$0xff] }
  0x87   :  { %329 = vmatprep.subr.bf16.mxu0 %v212_v33  ;;  %411 = vmatprep.subr.bf16.mxu1 %v214_v34  ;;  %v265_v27 = vld [vmem:[#allocation2 + $0x290] sm:$0xff]  ;;  %v268_v28 = vld [vmem:[#allocation2 + $0x2a8] sm:$0xff]  ;;  %v270_v29 = vld [vmem:[#allocation2 + $0x2b8] sm:$0xff] }
  0x88   :  { %v267_v30 = vld [vmem:[#allocation2 + $0x2a0] sm:$0xff]  ;;  %v269_v31 = vld [vmem:[#allocation2 + $0x2b0] sm:$0xff]  ;;  %v272_v32 = vld [vmem:[#allocation2 + $0x2c8] sm:$0xff] }
  0x89   :  { %v274_v33 = vld [vmem:[#allocation2 + $0x2d8] sm:$0xff]  ;;  %v271_v34 = vld [vmem:[#allocation2 + $0x2c0] sm:$0xff] }
  0x8a   :  { %330 = vmatpush1.bf16.msra.mxu0 %v211_v35  ;;  %412 = vmatpush1.bf16.msra.mxu1 %v213_v36  ;;  %v273_v35 = vld [vmem:[#allocation2 + $0x2d0] sm:$0xff]  ;;  %v276_v36 = vld [vmem:[#allocation2 + $0x2e8] sm:$0xff] }
  0x8b   :  { %331 = vmatprep.subr.bf16.mxu0 %v216_v37  ;;  %413 = vmatprep.subr.bf16.mxu1 %v218_v38  ;;  %v278_v37 = vld [vmem:[#allocation2 + $0x2f8] sm:$0xff]  ;;  %v275_v38 = vld [vmem:[#allocation2 + $0x2e0] sm:$0xff] }
  0x8e   :  { %332 = vmatpush1.bf16.msra.mxu0 %v215_v39  ;;  %414 = vmatpush1.bf16.msra.mxu1 %v217_v40  ;;  %v277_v39 = vld [vmem:[#allocation2 + $0x2f0] sm:$0xff]  ;;  %v280_v40 = vld [vmem:[#allocation2 + $0x308] sm:$0xff] }
  0x8f   :  { %333 = vmatprep.subr.bf16.mxu0 %v220_v41  ;;  %415 = vmatprep.subr.bf16.mxu1 %v222_v42  ;;  %v282_v41 = vld [vmem:[#allocation2 + $0x318] sm:$0xff]  ;;  %v279_v42 = vld [vmem:[#allocation2 + $0x300] sm:$0xff] }
  0x92   :  { %334 = vmatpush1.bf16.msra.mxu0 %v219_v43  ;;  %416 = vmatpush1.bf16.msra.mxu1 %v221_v44  ;;  %v281_v43 = vld [vmem:[#allocation2 + $0x310] sm:$0xff]  ;;  %v284_v44 = vld [vmem:[#allocation2 + $0x328] sm:$0xff] }
  0x93   :  { %335 = vmatprep.subr.bf16.mxu0 %v224_v45  ;;  %417 = vmatprep.subr.bf16.mxu1 %v226_v46  ;;  %v286_v45 = vld [vmem:[#allocation2 + $0x338] sm:$0xff]  ;;  %v283_v46 = vld [vmem:[#allocation2 + $0x320] sm:$0xff] }
  0x96   :  { %336 = vmatpush1.bf16.msra.mxu0 %v223_v47  ;;  %418 = vmatpush1.bf16.msra.mxu1 %v225_v48  ;;  %v285_v47 = vld [vmem:[#allocation2 + $0x330] sm:$0xff]  ;;  %v288_v48 = vld [vmem:[#allocation2 + $0x348] sm:$0xff] }
  0x97   :  { %337 = vmatprep.subr.bf16.mxu0 %v228_v49  ;;  %419 = vmatprep.subr.bf16.mxu1 %v230_v50  ;;  %v290_v49 = vld [vmem:[#allocation2 + $0x358] sm:$0xff]  ;;  %v287_v50 = vld [vmem:[#allocation2 + $0x340] sm:$0xff] }
  0x9a   :  { %338 = vmatpush1.bf16.msra.mxu0 %v227_v51  ;;  %420 = vmatpush1.bf16.msra.mxu1 %v229_v52  ;;  %v289_v51 = vld [vmem:[#allocation2 + $0x350] sm:$0xff]  ;;  %v292_v52 = vld [vmem:[#allocation2 + $0x368] sm:$0xff] }
  0x9b   :  { %339 = vmatprep.subr.bf16.mxu0 %v232_v53  ;;  %421 = vmatprep.subr.bf16.mxu1 %v234_v54  ;;  %v294_v53 = vld [vmem:[#allocation2 + $0x378] sm:$0xff]  ;;  %v291_v54 = vld [vmem:[#allocation2 + $0x360] sm:$0xff] }
  0x9e   :  { %340 = vmatpush1.bf16.msra.mxu0 %v231_v55  ;;  %422 = vmatpush1.bf16.msra.mxu1 %v233_v56  ;;  %v293_v55 = vld [vmem:[#allocation2 + $0x370] sm:$0xff]  ;;  %v296_v56 = vld [vmem:[#allocation2 + $0x388] sm:$0xff] }
  0x9f   :  { %341 = vmatprep.subr.bf16.mxu0 %v236_v57  ;;  %423 = vmatprep.subr.bf16.mxu1 %v238_v58  ;;  %v298_v57 = vld [vmem:[#allocation2 + $0x398] sm:$0xff]  ;;  %v295_v58 = vld [vmem:[#allocation2 + $0x380] sm:$0xff] }
  0xa2   :  { %342 = vmatpush1.bf16.msra.mxu0 %v235_v59  ;;  %424 = vmatpush1.bf16.msra.mxu1 %v237_v60  ;;  %v297_v59 = vld [vmem:[#allocation2 + $0x390] sm:$0xff]  ;;  %v300_v60 = vld [vmem:[#allocation2 + $0x3a8] sm:$0xff] }
  0xa3   :  { %343 = vmatprep.subr.bf16.mxu0 %v240_v61  ;;  %425 = vmatprep.subr.bf16.mxu1 %v242_v62  ;;  %v302_v61 = vld [vmem:[#allocation2 + $0x3b8] sm:$0xff]  ;;  %v299_v62 = vld [vmem:[#allocation2 + $0x3a0] sm:$0xff] }
  0xa6   :  { %344 = vmatpush1.bf16.msra.mxu0 %v239_v63  ;;  %426 = vmatpush1.bf16.msra.mxu1 %v241_v1  ;;  %v301_v63 = vld [vmem:[#allocation2 + $0x3b0] sm:$0xff]  ;;  %v304_v1 = vld [vmem:[#allocation2 + $0x3c8] sm:$0xff] }
  0xa7   :  { %345 = vmatprep.subr.bf16.mxu0 %v244_v4  ;;  %427 = vmatprep.subr.bf16.mxu1 %v246_v5  ;;  %v306_v4 = vld [vmem:[#allocation2 + $0x3d8] sm:$0xff]  ;;  %v303_v5 = vld [vmem:[#allocation2 + $0x3c0] sm:$0xff] }
  0xaa   :  { %346 = vmatpush1.bf16.msra.mxu0 %v243_v6  ;;  %428 = vmatpush1.bf16.msra.mxu1 %v245_v7  ;;  %v305_v6 = vld [vmem:[#allocation2 + $0x3d0] sm:$0xff]  ;;  %v308_v7 = vld [vmem:[#allocation2 + $0x3e8] sm:$0xff] }
  0xab   :  { %356 = vmatprep.subr.bf16.mxu0 %v248_v8  ;;  %438 = vmatprep.subr.bf16.mxu1 %v250_v9  ;;  %v310_v8 = vld [vmem:[#allocation2 + $0x3f8] sm:$0xff]  ;;  %v307_v9 = vld [vmem:[#allocation2 + $0x3e0] sm:$0xff] }
  0xad   :  { %348 = vmatmul.mubr.bf16.vlgmr.msra.gmra.mrb[0].mxu0 %v311_v10  ;;  %430 = vmatmul.mubr.bf16.vlgmr.msra.gmra.mrb[0].mxu1 %v311_v10  ;;  %v309_v10 = vld [vmem:[#allocation2 + $0x3f0] sm:$0xff] }
  0xae   :  { %357 = vmatpush1.bf16.msra.mxu0 %v247_v11  ;;  %439 = vmatpush1.bf16.msra.mxu1 %v249_v12  ;;  %v313_v11 = vpack.c.bf16 %v1513_v2, %v1513_v2 }
  0xaf   :  { %358 = vmatprep.subr.bf16.mxu0 %v252_v13  ;;  %440 = vmatprep.subr.bf16.mxu1 %v254_v14 }
  0xb0   :  { %388 = vmatprep.mubr.bf16.mxu0 %v314_v15  ;;  %470 = vmatprep.mubr.bf16.mxu1 %v314_v15 }
  0xb2   :  { %359 = vmatpush1.bf16.msra.mxu0 %v251_v16  ;;  %441 = vmatpush1.bf16.msra.mxu1 %v253_v17 }
  0xb3   :  { %360 = vmatprep.subr.bf16.mxu0 %v256_v0  ;;  %442 = vmatprep.subr.bf16.mxu1 %v258_v18 }
  0xb6   :  { %361 = vmatpush1.bf16.msra.mxu0 %v255_v19  ;;  %443 = vmatpush1.bf16.msra.mxu1 %v257_v20 }
  0xb7   :  { %362 = vmatprep.subr.bf16.mxu0 %v260_v21  ;;  %444 = vmatprep.subr.bf16.mxu1 %v262_v3 }
  0xba   :  { %363 = vmatpush1.bf16.msra.mxu0 %v259_v22  ;;  %445 = vmatpush1.bf16.msra.mxu1 %v261_v23 }
  0xbb   :  { %364 = vmatprep.subr.bf16.mxu0 %v264_v24  ;;  %446 = vmatprep.subr.bf16.mxu1 %v266_v25 }
  0xbe   :  { %365 = vmatpush1.bf16.msra.mxu0 %v263_v26  ;;  %447 = vmatpush1.bf16.msra.mxu1 %v265_v27 }
  0xbf   :  { %366 = vmatprep.subr.bf16.mxu0 %v268_v28  ;;  %448 = vmatprep.subr.bf16.mxu1 %v270_v29 }
  0xc2   :  { %367 = vmatpush1.bf16.msra.mxu0 %v267_v30  ;;  %449 = vmatpush1.bf16.msra.mxu1 %v269_v31 }
  0xc3   :  { %368 = vmatprep.subr.bf16.mxu0 %v272_v32  ;;  %450 = vmatprep.subr.bf16.mxu1 %v274_v33 }
  0xc6   :  { %369 = vmatpush1.bf16.msra.mxu0 %v271_v34  ;;  %451 = vmatpush1.bf16.msra.mxu1 %v273_v35 }
  0xc7   :  { %370 = vmatprep.subr.bf16.mxu0 %v276_v36  ;;  %452 = vmatprep.subr.bf16.mxu1 %v278_v37 }
  0xca   :  { %371 = vmatpush1.bf16.msra.mxu0 %v275_v38  ;;  %453 = vmatpush1.bf16.msra.mxu1 %v277_v39 }
  0xcb   :  { %372 = vmatprep.subr.bf16.mxu0 %v280_v40  ;;  %454 = vmatprep.subr.bf16.mxu1 %v282_v41 }
  0xce   :  { %373 = vmatpush1.bf16.msra.mxu0 %v279_v42  ;;  %455 = vmatpush1.bf16.msra.mxu1 %v281_v43 }
  0xcf   :  { %374 = vmatprep.subr.bf16.mxu0 %v284_v44  ;;  %456 = vmatprep.subr.bf16.mxu1 %v286_v45 }
  0xd2   :  { %375 = vmatpush1.bf16.msra.mxu0 %v283_v46  ;;  %457 = vmatpush1.bf16.msra.mxu1 %v285_v47 }
  0xd3   :  { %376 = vmatprep.subr.bf16.mxu0 %v288_v48  ;;  %458 = vmatprep.subr.bf16.mxu1 %v290_v49 }
  0xd6   :  { %377 = vmatpush1.bf16.msra.mxu0 %v287_v50  ;;  %459 = vmatpush1.bf16.msra.mxu1 %v289_v51 }
  0xd7   :  { %378 = vmatprep.subr.bf16.mxu0 %v292_v52  ;;  %460 = vmatprep.subr.bf16.mxu1 %v294_v53 }
  0xda   :  { %379 = vmatpush1.bf16.msra.mxu0 %v291_v54  ;;  %461 = vmatpush1.bf16.msra.mxu1 %v293_v55 }
  0xdb   :  { %380 = vmatprep.subr.bf16.mxu0 %v296_v56  ;;  %462 = vmatprep.subr.bf16.mxu1 %v298_v57 }
  0xde   :  { %381 = vmatpush1.bf16.msra.mxu0 %v295_v58  ;;  %463 = vmatpush1.bf16.msra.mxu1 %v297_v59 }
  0xdf   :  { %382 = vmatprep.subr.bf16.mxu0 %v300_v60  ;;  %464 = vmatprep.subr.bf16.mxu1 %v302_v61 }
  0xe2   :  { %383 = vmatpush1.bf16.msra.mxu0 %v299_v62  ;;  %465 = vmatpush1.bf16.msra.mxu1 %v301_v63 }
  0xe3   :  { %384 = vmatprep.subr.bf16.mxu0 %v304_v1  ;;  %466 = vmatprep.subr.bf16.mxu1 %v306_v4 }
  0xe6   :  { %385 = vmatpush1.bf16.msra.mxu0 %v303_v5  ;;  %467 = vmatpush1.bf16.msra.mxu1 %v305_v6 }
  0xe7   :  { %386 = vmatprep.subr.bf16.mxu0 %v308_v7  ;;  %468 = vmatprep.subr.bf16.mxu1 %v310_v8 }
  0xea   :  { %387 = vmatpush1.bf16.msra.mxu0 %v307_v9  ;;  %469 = vmatpush1.bf16.msra.mxu1 %v309_v10 }
  0xed   :  { %389 = vmatmul.mubr.bf16.vlgmr.msra.gmra.mrb[0].mxu0 %v313_v11  ;;  %471 = vmatmul.mubr.bf16.vlgmr.msra.gmra.mrb[0].mxu1 %v313_v11 }
 0x1c0   :  { %v1523_v12 = vpop.f32.mrb[0].mxu0  ;;  %v1525_v13 = vpop.f32.mrb[0].mxu1 }
 0x1c1   :  { %v479_v14 = vmax.f32 %v1523_v12, 0.0  ;;  %v481_v15 = vmax.f32 %v1525_v13, 0.0  ;;  %v1529_v16 = vpop.f32.mrb[1].mxu0  ;;  %v1531_v17 = vpop.f32.mrb[1].mxu1 }
 0x1c2   :  { %v480_v0 = vmax.f32 %v1529_v16, 0.0  ;;  %v482_v2 = vmax.f32 %v1531_v17, 0.0  ;;  %v394_v18 = vpop.f32.mrb[2].mxu0  ;;  %v476_v19 = vpop.f32.mrb[2].mxu1 }
 0x1c3   :  { %v395_v20 = vpop.f32.mrb[3].mxu0  ;;  %v477_v21 = vpop.f32.mrb[3].mxu1 }
 0x1c4   :  { %1366 = dma.done.wait [#allocation3 + $0x1], 16384 }
 0x1c5   :  { %1367 = vsyncadd [#allocation3 + $0x1], 4294950912  ;;  %v614_v3 = vpack.c.bf16 %v480_v0, %v480_v0  ;;  %v486_v22 = vld [vmem:[#allocation2 + $0x408] sm:$0xff]  ;;  %v488_v23 = vld [vmem:[#allocation2 + $0x418] sm:$0xff] }
 0x1c6   :  { %v485_v24 = vld [vmem:[#allocation2 + $0x400] sm:$0xff]  ;;  %639 = vmatprep.subr.bf16.mxu0 %v486_v22  ;;  %721 = vmatprep.subr.bf16.mxu1 %v488_v23  ;;  %v487_v25 = vld [vmem:[#allocation2 + $0x410] sm:$0xff]  ;;  %v490_v26 = vld [vmem:[#allocation2 + $0x428] sm:$0xff] }
 0x1c7   :  { %671 = vmatprep.mubr.bf16.mxu0 %v614_v3  ;;  %753 = vmatprep.mubr.bf16.mxu1 %v614_v3  ;;  %v492_v27 = vld [vmem:[#allocation2 + $0x438] sm:$0xff]  ;;  %v489_v28 = vld [vmem:[#allocation2 + $0x420] sm:$0xff]  ;;  %v491_v29 = vld [vmem:[#allocation2 + $0x430] sm:$0xff] }
 0x1c8   :  { %640 = vmatpush1.bf16.msra.mxu0 %v485_v24  ;;  %722 = vmatpush1.bf16.msra.mxu1 %v487_v25  ;;  %v494_v30 = vld [vmem:[#allocation2 + $0x448] sm:$0xff]  ;;  %v496_v31 = vld [vmem:[#allocation2 + $0x458] sm:$0xff]  ;;  %v493_v32 = vld [vmem:[#allocation2 + $0x440] sm:$0xff] }
 0x1c9   :  { %641 = vmatprep.subr.bf16.mxu0 %v490_v26  ;;  %723 = vmatprep.subr.bf16.mxu1 %v492_v27  ;;  %v495_v33 = vld [vmem:[#allocation2 + $0x450] sm:$0xff]  ;;  %v498_v34 = vld [vmem:[#allocation2 + $0x468] sm:$0xff]  ;;  %v500_v35 = vld [vmem:[#allocation2 + $0x478] sm:$0xff] }
 0x1ca   :  { %v497_v36 = vld [vmem:[#allocation2 + $0x460] sm:$0xff]  ;;  %v499_v37 = vld [vmem:[#allocation2 + $0x470] sm:$0xff]  ;;  %v502_v38 = vld [vmem:[#allocation2 + $0x488] sm:$0xff] }
 0x1cb   :  { %v504_v39 = vld [vmem:[#allocation2 + $0x498] sm:$0xff]  ;;  %v501_v40 = vld [vmem:[#allocation2 + $0x480] sm:$0xff]  ;;  %v503_v41 = vld [vmem:[#allocation2 + $0x490] sm:$0xff] }
 0x1cc   :  { %642 = vmatpush1.bf16.msra.mxu0 %v489_v28  ;;  %724 = vmatpush1.bf16.msra.mxu1 %v491_v29  ;;  %v506_v42 = vld [vmem:[#allocation2 + $0x4a8] sm:$0xff]  ;;  %v508_v43 = vld [vmem:[#allocation2 + $0x4b8] sm:$0xff]  ;;  %v505_v44 = vld [vmem:[#allocation2 + $0x4a0] sm:$0xff] }
 0x1cd   :  { %643 = vmatprep.subr.bf16.mxu0 %v494_v30  ;;  %725 = vmatprep.subr.bf16.mxu1 %v496_v31  ;;  %v507_v45 = vld [vmem:[#allocation2 + $0x4b0] sm:$0xff]  ;;  %v510_v46 = vld [vmem:[#allocation2 + $0x4c8] sm:$0xff]  ;;  %v512_v47 = vld [vmem:[#allocation2 + $0x4d8] sm:$0xff]  ;;  %v613_v31 = vpack.c.bf16 %v479_v14, %v479_v14 }
 0x1ce   :  { %v509_v48 = vld [vmem:[#allocation2 + $0x4c0] sm:$0xff]  ;;  %v511_v49 = vld [vmem:[#allocation2 + $0x4d0] sm:$0xff]  ;;  %v514_v50 = vld [vmem:[#allocation2 + $0x4e8] sm:$0xff] }
 0x1cf   :  { %v516_v51 = vld [vmem:[#allocation2 + $0x4f8] sm:$0xff]  ;;  %v513_v52 = vld [vmem:[#allocation2 + $0x4e0] sm:$0xff]  ;;  %v515_v53 = vld [vmem:[#allocation2 + $0x4f0] sm:$0xff] }
 0x1d0   :  { %644 = vmatpush1.bf16.msra.mxu0 %v493_v32  ;;  %726 = vmatpush1.bf16.msra.mxu1 %v495_v33  ;;  %v518_v54 = vld [vmem:[#allocation2 + $0x508] sm:$0xff]  ;;  %v520_v55 = vld [vmem:[#allocation2 + $0x518] sm:$0xff]  ;;  %v517_v56 = vld [vmem:[#allocation2 + $0x500] sm:$0xff] }
 0x1d1   :  { %645 = vmatprep.subr.bf16.mxu0 %v498_v34  ;;  %727 = vmatprep.subr.bf16.mxu1 %v500_v35  ;;  %v519_v57 = vld [vmem:[#allocation2 + $0x510] sm:$0xff]  ;;  %v522_v58 = vld [vmem:[#allocation2 + $0x528] sm:$0xff]  ;;  %v524_v59 = vld [vmem:[#allocation2 + $0x538] sm:$0xff] }
 0x1d2   :  { %v521_v60 = vld [vmem:[#allocation2 + $0x520] sm:$0xff]  ;;  %v523_v61 = vld [vmem:[#allocation2 + $0x530] sm:$0xff]  ;;  %v526_v62 = vld [vmem:[#allocation2 + $0x548] sm:$0xff] }
 0x1d3   :  { %v528_v63 = vld [vmem:[#allocation2 + $0x558] sm:$0xff]  ;;  %v525_v1 = vld [vmem:[#allocation2 + $0x540] sm:$0xff]  ;;  %v527_v4 = vld [vmem:[#allocation2 + $0x550] sm:$0xff] }
 0x1d4   :  { %646 = vmatpush1.bf16.msra.mxu0 %v497_v36  ;;  %728 = vmatpush1.bf16.msra.mxu1 %v499_v37  ;;  %v530_v5 = vld [vmem:[#allocation2 + $0x568] sm:$0xff]  ;;  %v532_v6 = vld [vmem:[#allocation2 + $0x578] sm:$0xff]  ;;  %v529_v7 = vld [vmem:[#allocation2 + $0x560] sm:$0xff]  ;;  %v616_v36 = vpack.c.bf16 %v482_v2, %v482_v2 }
 0x1d5   :  { %647 = vmatprep.subr.bf16.mxu0 %v502_v38  ;;  %729 = vmatprep.subr.bf16.mxu1 %v504_v39  ;;  %v531_v8 = vld [vmem:[#allocation2 + $0x570] sm:$0xff]  ;;  %v534_v9 = vld [vmem:[#allocation2 + $0x588] sm:$0xff]  ;;  %v536_v10 = vld [vmem:[#allocation2 + $0x598] sm:$0xff] }
 0x1d6   :  { %v533_v11 = vld [vmem:[#allocation2 + $0x580] sm:$0xff]  ;;  %v535_v0 = vld [vmem:[#allocation2 + $0x590] sm:$0xff]  ;;  %v538_v18 = vld [vmem:[#allocation2 + $0x5a8] sm:$0xff] }
 0x1d7   :  { %v540_v19 = vld [vmem:[#allocation2 + $0x5b8] sm:$0xff]  ;;  %v537_v20 = vld [vmem:[#allocation2 + $0x5a0] sm:$0xff]  ;;  %v539_v21 = vld [vmem:[#allocation2 + $0x5b0] sm:$0xff] }
 0x1d8   :  { %648 = vmatpush1.bf16.msra.mxu0 %v501_v40  ;;  %730 = vmatpush1.bf16.msra.mxu1 %v503_v41  ;;  %v542_v3 = vld [vmem:[#allocation2 + $0x5c8] sm:$0xff]  ;;  %v544_v22 = vld [vmem:[#allocation2 + $0x5d8] sm:$0xff]  ;;  %v541_v23 = vld [vmem:[#allocation2 + $0x5c0] sm:$0xff] }
 0x1d9   :  { %649 = vmatprep.subr.bf16.mxu0 %v506_v42  ;;  %731 = vmatprep.subr.bf16.mxu1 %v508_v43  ;;  %v543_v24 = vld [vmem:[#allocation2 + $0x5d0] sm:$0xff]  ;;  %v546_v25 = vld [vmem:[#allocation2 + $0x5e8] sm:$0xff]  ;;  %v548_v26 = vld [vmem:[#allocation2 + $0x5f8] sm:$0xff] }
 0x1da   :  { %v545_v27 = vld [vmem:[#allocation2 + $0x5e0] sm:$0xff]  ;;  %v547_v28 = vld [vmem:[#allocation2 + $0x5f0] sm:$0xff]  ;;  %v550_v29 = vld [vmem:[#allocation2 + $0x608] sm:$0xff] }
 0x1db   :  { %v552_v30 = vld [vmem:[#allocation2 + $0x618] sm:$0xff]  ;;  %v549_v32 = vld [vmem:[#allocation2 + $0x600] sm:$0xff]  ;;  %v551_v33 = vld [vmem:[#allocation2 + $0x610] sm:$0xff] }
 0x1dc   :  { %650 = vmatpush1.bf16.msra.mxu0 %v505_v44  ;;  %732 = vmatpush1.bf16.msra.mxu1 %v507_v45  ;;  %v554_v34 = vld [vmem:[#allocation2 + $0x628] sm:$0xff]  ;;  %v556_v35 = vld [vmem:[#allocation2 + $0x638] sm:$0xff]  ;;  %v553_v37 = vld [vmem:[#allocation2 + $0x620] sm:$0xff] }
 0x1dd   :  { %651 = vmatprep.subr.bf16.mxu0 %v510_v46  ;;  %733 = vmatprep.subr.bf16.mxu1 %v512_v47  ;;  %v555_v14 = vld [vmem:[#allocation2 + $0x630] sm:$0xff]  ;;  %v558_v38 = vld [vmem:[#allocation2 + $0x648] sm:$0xff]  ;;  %v560_v39 = vld [vmem:[#allocation2 + $0x658] sm:$0xff] }
 0x1de   :  { %v557_v40 = vld [vmem:[#allocation2 + $0x640] sm:$0xff]  ;;  %v559_v41 = vld [vmem:[#allocation2 + $0x650] sm:$0xff]  ;;  %v562_v42 = vld [vmem:[#allocation2 + $0x668] sm:$0xff] }
 0x1df   :  { %v564_v2 = vld [vmem:[#allocation2 + $0x678] sm:$0xff]  ;;  %v561_v43 = vld [vmem:[#allocation2 + $0x660] sm:$0xff]  ;;  %v563_v44 = vld [vmem:[#allocation2 + $0x670] sm:$0xff] }
 0x1e0   :  { %652 = vmatpush1.bf16.msra.mxu0 %v509_v48  ;;  %734 = vmatpush1.bf16.msra.mxu1 %v511_v49  ;;  %v566_v45 = vld [vmem:[#allocation2 + $0x688] sm:$0xff]  ;;  %v568_v46 = vld [vmem:[#allocation2 + $0x698] sm:$0xff]  ;;  %v565_v47 = vld [vmem:[#allocation2 + $0x680] sm:$0xff] }
 0x1e1   :  { %653 = vmatprep.subr.bf16.mxu0 %v514_v50  ;;  %735 = vmatprep.subr.bf16.mxu1 %v516_v51  ;;  %v567_v48 = vld [vmem:[#allocation2 + $0x690] sm:$0xff]  ;;  %v570_v49 = vld [vmem:[#allocation2 + $0x6a8] sm:$0xff]  ;;  %v572_v50 = vld [vmem:[#allocation2 + $0x6b8] sm:$0xff] }
 0x1e2   :  { %v569_v51 = vld [vmem:[#allocation2 + $0x6a0] sm:$0xff] }
 0x1e4   :  { %654 = vmatpush1.bf16.msra.mxu0 %v513_v52  ;;  %736 = vmatpush1.bf16.msra.mxu1 %v515_v53  ;;  %v571_v52 = vld [vmem:[#allocation2 + $0x6b0] sm:$0xff]  ;;  %v574_v53 = vld [vmem:[#allocation2 + $0x6c8] sm:$0xff] }
 0x1e5   :  { %655 = vmatprep.subr.bf16.mxu0 %v518_v54  ;;  %737 = vmatprep.subr.bf16.mxu1 %v520_v55  ;;  %v576_v54 = vld [vmem:[#allocation2 + $0x6d8] sm:$0xff]  ;;  %v573_v55 = vld [vmem:[#allocation2 + $0x6c0] sm:$0xff] }
 0x1e8   :  { %656 = vmatpush1.bf16.msra.mxu0 %v517_v56  ;;  %738 = vmatpush1.bf16.msra.mxu1 %v519_v57  ;;  %v575_v56 = vld [vmem:[#allocation2 + $0x6d0] sm:$0xff]  ;;  %v578_v57 = vld [vmem:[#allocation2 + $0x6e8] sm:$0xff] }
 0x1e9   :  { %657 = vmatprep.subr.bf16.mxu0 %v522_v58  ;;  %739 = vmatprep.subr.bf16.mxu1 %v524_v59  ;;  %v580_v58 = vld [vmem:[#allocation2 + $0x6f8] sm:$0xff]  ;;  %v577_v59 = vld [vmem:[#allocation2 + $0x6e0] sm:$0xff] }
 0x1ec   :  { %658 = vmatpush1.bf16.msra.mxu0 %v521_v60  ;;  %740 = vmatpush1.bf16.msra.mxu1 %v523_v61  ;;  %v579_v60 = vld [vmem:[#allocation2 + $0x6f0] sm:$0xff]  ;;  %v582_v61 = vld [vmem:[#allocation2 + $0x708] sm:$0xff] }
 0x1ed   :  { %659 = vmatprep.subr.bf16.mxu0 %v526_v62  ;;  %741 = vmatprep.subr.bf16.mxu1 %v528_v63  ;;  %v584_v62 = vld [vmem:[#allocation2 + $0x718] sm:$0xff]  ;;  %v581_v63 = vld [vmem:[#allocation2 + $0x700] sm:$0xff] }
 0x1f0   :  { %660 = vmatpush1.bf16.msra.mxu0 %v525_v1  ;;  %742 = vmatpush1.bf16.msra.mxu1 %v527_v4  ;;  %v583_v1 = vld [vmem:[#allocation2 + $0x710] sm:$0xff]  ;;  %v586_v4 = vld [vmem:[#allocation2 + $0x728] sm:$0xff] }
 0x1f1   :  { %661 = vmatprep.subr.bf16.mxu0 %v530_v5  ;;  %743 = vmatprep.subr.bf16.mxu1 %v532_v6  ;;  %v588_v5 = vld [vmem:[#allocation2 + $0x738] sm:$0xff]  ;;  %v585_v6 = vld [vmem:[#allocation2 + $0x720] sm:$0xff] }
 0x1f4   :  { %662 = vmatpush1.bf16.msra.mxu0 %v529_v7  ;;  %744 = vmatpush1.bf16.msra.mxu1 %v531_v8  ;;  %v587_v7 = vld [vmem:[#allocation2 + $0x730] sm:$0xff]  ;;  %v590_v8 = vld [vmem:[#allocation2 + $0x748] sm:$0xff] }
 0x1f5   :  { %663 = vmatprep.subr.bf16.mxu0 %v534_v9  ;;  %745 = vmatprep.subr.bf16.mxu1 %v536_v10  ;;  %v592_v9 = vld [vmem:[#allocation2 + $0x758] sm:$0xff]  ;;  %v589_v10 = vld [vmem:[#allocation2 + $0x740] sm:$0xff] }
 0x1f8   :  { %664 = vmatpush1.bf16.msra.mxu0 %v533_v11  ;;  %746 = vmatpush1.bf16.msra.mxu1 %v535_v0  ;;  %v591_v11 = vld [vmem:[#allocation2 + $0x750] sm:$0xff]  ;;  %v594_v0 = vld [vmem:[#allocation2 + $0x768] sm:$0xff] }
 0x1f9   :  { %665 = vmatprep.subr.bf16.mxu0 %v538_v18  ;;  %747 = vmatprep.subr.bf16.mxu1 %v540_v19  ;;  %v596_v18 = vld [vmem:[#allocation2 + $0x778] sm:$0xff]  ;;  %v593_v19 = vld [vmem:[#allocation2 + $0x760] sm:$0xff] }
 0x1fc   :  { %666 = vmatpush1.bf16.msra.mxu0 %v537_v20  ;;  %748 = vmatpush1.bf16.msra.mxu1 %v539_v21  ;;  %v595_v20 = vld [vmem:[#allocation2 + $0x770] sm:$0xff]  ;;  %v598_v21 = vld [vmem:[#allocation2 + $0x788] sm:$0xff] }
 0x1fd   :  { %667 = vmatprep.subr.bf16.mxu0 %v542_v3  ;;  %749 = vmatprep.subr.bf16.mxu1 %v544_v22  ;;  %v600_v3 = vld [vmem:[#allocation2 + $0x798] sm:$0xff]  ;;  %v597_v22 = vld [vmem:[#allocation2 + $0x780] sm:$0xff] }
 0x200   :  { %668 = vmatpush1.bf16.msra.mxu0 %v541_v23  ;;  %750 = vmatpush1.bf16.msra.mxu1 %v543_v24  ;;  %v599_v23 = vld [vmem:[#allocation2 + $0x790] sm:$0xff]  ;;  %v602_v24 = vld [vmem:[#allocation2 + $0x7a8] sm:$0xff] }
 0x201   :  { %669 = vmatprep.subr.bf16.mxu0 %v546_v25  ;;  %751 = vmatprep.subr.bf16.mxu1 %v548_v26  ;;  %v604_v25 = vld [vmem:[#allocation2 + $0x7b8] sm:$0xff]  ;;  %v601_v26 = vld [vmem:[#allocation2 + $0x7a0] sm:$0xff] }
 0x204   :  { %670 = vmatpush1.bf16.msra.mxu0 %v545_v27  ;;  %752 = vmatpush1.bf16.msra.mxu1 %v547_v28  ;;  %v603_v27 = vld [vmem:[#allocation2 + $0x7b0] sm:$0xff]  ;;  %v606_v28 = vld [vmem:[#allocation2 + $0x7c8] sm:$0xff] }
 0x205   :  { %680 = vmatprep.subr.bf16.mxu0 %v550_v29  ;;  %762 = vmatprep.subr.bf16.mxu1 %v552_v30  ;;  %v608_v29 = vld [vmem:[#allocation2 + $0x7d8] sm:$0xff]  ;;  %v605_v30 = vld [vmem:[#allocation2 + $0x7c0] sm:$0xff] }
 0x207   :  { %672 = vmatmul.mubr.bf16.vlgmr.msra.gmra.mrb[4].mxu0 %v613_v31  ;;  %754 = vmatmul.mubr.bf16.vlgmr.msra.gmra.mrb[4].mxu1 %v613_v31  ;;  %v607_v31 = vld [vmem:[#allocation2 + $0x7d0] sm:$0xff] }
 0x208   :  { %681 = vmatpush1.bf16.msra.mxu0 %v549_v32  ;;  %763 = vmatpush1.bf16.msra.mxu1 %v551_v33  ;;  %v610_v32 = vld [vmem:[#allocation2 + $0x7e8] sm:$0xff]  ;;  %v612_v33 = vld [vmem:[#allocation2 + $0x7f8] sm:$0xff] }
 0x209   :  { %682 = vmatprep.subr.bf16.mxu0 %v554_v34  ;;  %764 = vmatprep.subr.bf16.mxu1 %v556_v35  ;;  %v609_v34 = vld [vmem:[#allocation2 + $0x7e0] sm:$0xff]  ;;  %v611_v35 = vld [vmem:[#allocation2 + $0x7f0] sm:$0xff] }
 0x20a   :  { %712 = vmatprep.mubr.bf16.mxu0 %v616_v36  ;;  %794 = vmatprep.mubr.bf16.mxu1 %v616_v36  ;;  %v615_v36 = vpack.c.bf16 %v481_v15, %v481_v15 }
 0x20c   :  { %683 = vmatpush1.bf16.msra.mxu0 %v553_v37  ;;  %765 = vmatpush1.bf16.msra.mxu1 %v555_v14  ;;  %v619_v37 = vlaneseq }
 0x20d   :  { %684 = vmatprep.subr.bf16.mxu0 %v558_v38  ;;  %766 = vmatprep.subr.bf16.mxu1 %v560_v39 }
 0x20e   :  { %v1544_v14 = vshrl.u32 %v619_v37, 7 }
 0x210   :  { %685 = vmatpush1.bf16.msra.mxu0 %v557_v40  ;;  %767 = vmatpush1.bf16.msra.mxu1 %v559_v41  ;;  %v621_v38 = vsub.s32 0, %v1544_v14  ;;  %v629_v39 = vsub.s32 2, %v1544_v14  ;;  %v617_v40 = vld [vmem:[#allocation9] sm:$0xf]  ;;  %v625_v41 = vsub.s32 1, %v1544_v14 }
 0x211   :  { %686 = vmatprep.subr.bf16.mxu0 %v562_v42  ;;  %768 = vmatprep.subr.bf16.mxu1 %v564_v2  ;;  %v633_v42 = vsub.s32 3, %v1544_v14 }
 0x212   :  { %v622_v2 = vrot.slane %v617_v40, %v621_v38  ;;  %v630_v15 = vrot.slane %v617_v40, %v629_v39 }
 0x214   :  { %687 = vmatpush1.bf16.msra.mxu0 %v561_v43  ;;  %769 = vmatpush1.bf16.msra.mxu1 %v563_v44  ;;  %v626_v43 = vrot.slane %v617_v40, %v625_v41  ;;  %v634_v44 = vrot.slane %v617_v40, %v633_v42 }
 0x215   :  { %688 = vmatprep.subr.bf16.mxu0 %v566_v45  ;;  %770 = vmatprep.subr.bf16.mxu1 %v568_v46 }
 0x218   :  { %689 = vmatpush1.bf16.msra.mxu0 %v565_v47  ;;  %771 = vmatpush1.bf16.msra.mxu1 %v567_v48 }
 0x219   :  { %690 = vmatprep.subr.bf16.mxu0 %v570_v49  ;;  %772 = vmatprep.subr.bf16.mxu1 %v572_v50 }
 0x21c   :  { %691 = vmatpush1.bf16.msra.mxu0 %v569_v51  ;;  %773 = vmatpush1.bf16.msra.mxu1 %v571_v52 }
 0x21d   :  { %692 = vmatprep.subr.bf16.mxu0 %v574_v53  ;;  %774 = vmatprep.subr.bf16.mxu1 %v576_v54 }
 0x220   :  { %693 = vmatpush1.bf16.msra.mxu0 %v573_v55  ;;  %775 = vmatpush1.bf16.msra.mxu1 %v575_v56 }
 0x221   :  { %694 = vmatprep.subr.bf16.mxu0 %v578_v57  ;;  %776 = vmatprep.subr.bf16.mxu1 %v580_v58 }
 0x224   :  { %695 = vmatpush1.bf16.msra.mxu0 %v577_v59  ;;  %777 = vmatpush1.bf16.msra.mxu1 %v579_v60 }
 0x225   :  { %696 = vmatprep.subr.bf16.mxu0 %v582_v61  ;;  %778 = vmatprep.subr.bf16.mxu1 %v584_v62 }
 0x228   :  { %697 = vmatpush1.bf16.msra.mxu0 %v581_v63  ;;  %779 = vmatpush1.bf16.msra.mxu1 %v583_v1 }
 0x229   :  { %698 = vmatprep.subr.bf16.mxu0 %v586_v4  ;;  %780 = vmatprep.subr.bf16.mxu1 %v588_v5 }
 0x22c   :  { %699 = vmatpush1.bf16.msra.mxu0 %v585_v6  ;;  %781 = vmatpush1.bf16.msra.mxu1 %v587_v7 }
 0x22d   :  { %700 = vmatprep.subr.bf16.mxu0 %v590_v8  ;;  %782 = vmatprep.subr.bf16.mxu1 %v592_v9 }
 0x230   :  { %701 = vmatpush1.bf16.msra.mxu0 %v589_v10  ;;  %783 = vmatpush1.bf16.msra.mxu1 %v591_v11 }
 0x231   :  { %702 = vmatprep.subr.bf16.mxu0 %v594_v0  ;;  %784 = vmatprep.subr.bf16.mxu1 %v596_v18 }
 0x234   :  { %703 = vmatpush1.bf16.msra.mxu0 %v593_v19  ;;  %785 = vmatpush1.bf16.msra.mxu1 %v595_v20 }
 0x235   :  { %704 = vmatprep.subr.bf16.mxu0 %v598_v21  ;;  %786 = vmatprep.subr.bf16.mxu1 %v600_v3 }
 0x238   :  { %705 = vmatpush1.bf16.msra.mxu0 %v597_v22  ;;  %787 = vmatpush1.bf16.msra.mxu1 %v599_v23 }
 0x239   :  { %706 = vmatprep.subr.bf16.mxu0 %v602_v24  ;;  %788 = vmatprep.subr.bf16.mxu1 %v604_v25 }
 0x23c   :  { %707 = vmatpush1.bf16.msra.mxu0 %v601_v26  ;;  %789 = vmatpush1.bf16.msra.mxu1 %v603_v27 }
 0x23d   :  { %708 = vmatprep.subr.bf16.mxu0 %v606_v28  ;;  %790 = vmatprep.subr.bf16.mxu1 %v608_v29 }
 0x240   :  { %709 = vmatpush1.bf16.msra.mxu0 %v605_v30  ;;  %791 = vmatpush1.bf16.msra.mxu1 %v607_v31 }
 0x241   :  { %710 = vmatprep.subr.bf16.mxu0 %v610_v32  ;;  %792 = vmatprep.subr.bf16.mxu1 %v612_v33 }
 0x244   :  { %711 = vmatpush1.bf16.msra.mxu0 %v609_v34  ;;  %793 = vmatpush1.bf16.msra.mxu1 %v611_v35 }
 0x247   :  { %713 = vmatmul.mubr.bf16.vlgmr.msra.gmra.mrb[4].mxu0 %v615_v36  ;;  %795 = vmatmul.mubr.bf16.vlgmr.msra.gmra.mrb[4].mxu1 %v615_v36 }
 0x31a   :  { %v714_v45 = vpop.f32.mrb[4].mxu0  ;;  %v796_v46 = vpop.f32.mrb[4].mxu1 }
 0x31b   :  { %v1206_v47 = vadd.f32 %v714_v45, %v622_v2  ;;  %v1208_v48 = vadd.f32 %v796_v46, %v630_v15  ;;  %v716_v49 = vpop.f32.mrb[5].mxu0  ;;  %v798_v50 = vpop.f32.mrb[5].mxu1 }
 0x31c   :  { %v1207_v51 = vadd.f32 %v716_v49, %v626_v43  ;;  %v1209_v52 = vadd.f32 %v798_v50, %v634_v44  ;;  %v718_v53 = vpop.f32.mrb[6].mxu0  ;;  %v800_v54 = vpop.f32.mrb[6].mxu1 }
 0x31d   :  { %v803_v55 = vmax.f32 %v1206_v47, 0.0  ;;  %v805_v56 = vmax.f32 %v1208_v48, 0.0  ;;  %v719_v57 = vpop.f32.mrb[7].mxu0  ;;  %v801_v58 = vpop.f32.mrb[7].mxu1 }
 0x31e   :  { %v804_v59 = vmax.f32 %v1207_v51, 0.0  ;;  %v806_v60 = vmax.f32 %v1209_v52, 0.0 }
 0x31f   :  { %v1559_v61 = vadd.f32 %v803_v55, %v1523_v12  ;;  %v1562_v62 = vadd.f32 %v805_v56, %v1525_v13 }
 0x320   :  { %v808_v63 = vadd.f32 %v804_v59, %v1529_v16  ;;  %v1566_v1 = vadd.f32 %v806_v60, %v1531_v17 }
 0x321   :  { %1368 = dma.done.wait [#allocation3 + $0x2], 16384 }
 0x322   :  { %1369 = vsyncadd [#allocation3 + $0x2], 4294950912  ;;  %v942_v4 = vpack.c.bf16 %v808_v63, %v808_v63  ;;  %v814_v5 = vld [vmem:[#allocation2 + $0x808] sm:$0xff]  ;;  %v816_v6 = vld [vmem:[#allocation2 + $0x818] sm:$0xff]  ;;  %s1348_s1 = scalar_lea.hbm %s1599_s5, 16 }
 0x323   :  { %v813_v7 = vld [vmem:[#allocation2 + $0x800] sm:$0xff]  ;;  %967 = vmatprep.subr.bf16.mxu0 %v814_v5  ;;  %1049 = vmatprep.subr.bf16.mxu1 %v816_v6  ;;  %v815_v12 = vld [vmem:[#allocation2 + $0x810] sm:$0xff]  ;;  %v818_v8 = vld [vmem:[#allocation2 + $0x828] sm:$0xff]  ;;  %p1349_p4 = scmp.ne.s32.totalorder %s1599_s5, %s1348_s1  ;;  %p1352_p5 = scmp.lt.u32.totalorder %s1348_s1, %s1599_s5 }
 0x324   :  { %999 = vmatprep.mubr.bf16.mxu0 %v942_v4  ;;  %1081 = vmatprep.mubr.bf16.mxu1 %v942_v4  ;;  %v820_v9 = vld [vmem:[#allocation2 + $0x838] sm:$0xff]  ;;  %v817_v13 = vld [vmem:[#allocation2 + $0x820] sm:$0xff]  ;;  %v819_v16 = vld [vmem:[#allocation2 + $0x830] sm:$0xff] }
 0x325   :  { %968 = vmatpush1.bf16.msra.mxu0 %v813_v7  ;;  %1050 = vmatpush1.bf16.msra.mxu1 %v815_v12  ;;  %v822_v17 = vld [vmem:[#allocation2 + $0x848] sm:$0xff]  ;;  %v824_v10 = vld [vmem:[#allocation2 + $0x858] sm:$0xff]  ;;  %v821_v11 = vld [vmem:[#allocation2 + $0x840] sm:$0xff]  ;;  %p1354_p6 = pnand %p1352_p5, %p1349_p4 }
 0x326   :  { %969 = vmatprep.subr.bf16.mxu0 %v818_v8  ;;  %1051 = vmatprep.subr.bf16.mxu1 %v820_v9  ;;  %v823_v0 = vld [vmem:[#allocation2 + $0x850] sm:$0xff]  ;;  %v826_v18 = vld [vmem:[#allocation2 + $0x868] sm:$0xff]  ;;  %v828_v19 = vld [vmem:[#allocation2 + $0x878] sm:$0xff] }
 0x327   :  { %v825_v20 = vld [vmem:[#allocation2 + $0x860] sm:$0xff]  ;;  %v827_v21 = vld [vmem:[#allocation2 + $0x870] sm:$0xff]  ;;  %v830_v3 = vld [vmem:[#allocation2 + $0x888] sm:$0xff] }
 0x328   :  { %v832_v22 = vld [vmem:[#allocation2 + $0x898] sm:$0xff]  ;;  %v829_v23 = vld [vmem:[#allocation2 + $0x880] sm:$0xff]  ;;  %v831_v24 = vld [vmem:[#allocation2 + $0x890] sm:$0xff] }
 0x329   :  { %970 = vmatpush1.bf16.msra.mxu0 %v817_v13  ;;  %1052 = vmatpush1.bf16.msra.mxu1 %v819_v16  ;;  %v834_v25 = vld [vmem:[#allocation2 + $0x8a8] sm:$0xff]  ;;  %v836_v26 = vld [vmem:[#allocation2 + $0x8b8] sm:$0xff]  ;;  %v833_v27 = vld [vmem:[#allocation2 + $0x8a0] sm:$0xff] }
 0x32a   :  { %971 = vmatprep.subr.bf16.mxu0 %v822_v17  ;;  %1053 = vmatprep.subr.bf16.mxu1 %v824_v10  ;;  %v835_v28 = vld [vmem:[#allocation2 + $0x8b0] sm:$0xff]  ;;  %v838_v29 = vld [vmem:[#allocation2 + $0x8c8] sm:$0xff]  ;;  %v840_v30 = vld [vmem:[#allocation2 + $0x8d8] sm:$0xff] }
 0x32b   :  { %v837_v31 = vld [vmem:[#allocation2 + $0x8c0] sm:$0xff]  ;;  %v839_v32 = vld [vmem:[#allocation2 + $0x8d0] sm:$0xff]  ;;  %v842_v33 = vld [vmem:[#allocation2 + $0x8e8] sm:$0xff] }
 0x32c   :  { %v844_v34 = vld [vmem:[#allocation2 + $0x8f8] sm:$0xff]  ;;  %v841_v35 = vld [vmem:[#allocation2 + $0x8e0] sm:$0xff]  ;;  %v843_v36 = vld [vmem:[#allocation2 + $0x8f0] sm:$0xff] }
 0x32d   :  { %972 = vmatpush1.bf16.msra.mxu0 %v821_v11  ;;  %1054 = vmatpush1.bf16.msra.mxu1 %v823_v0  ;;  %v846_v37 = vld [vmem:[#allocation2 + $0x908] sm:$0xff]  ;;  %v848_v40 = vld [vmem:[#allocation2 + $0x918] sm:$0xff]  ;;  %v845_v2 = vld [vmem:[#allocation2 + $0x900] sm:$0xff]  ;;  %v941_v11 = vpack.c.bf16 %v1559_v61, %v1559_v61 }
 0x32e   :  { %973 = vmatprep.subr.bf16.mxu0 %v826_v18  ;;  %1055 = vmatprep.subr.bf16.mxu1 %v828_v19  ;;  %v847_v15 = vld [vmem:[#allocation2 + $0x910] sm:$0xff]  ;;  %v850_v43 = vld [vmem:[#allocation2 + $0x928] sm:$0xff]  ;;  %v852_v44 = vld [vmem:[#allocation2 + $0x938] sm:$0xff] }
 0x32f   :  { %v849_v45 = vld [vmem:[#allocation2 + $0x920] sm:$0xff]  ;;  %v851_v46 = vld [vmem:[#allocation2 + $0x930] sm:$0xff]  ;;  %v854_v47 = vld [vmem:[#allocation2 + $0x948] sm:$0xff] }
 0x330   :  { %v856_v48 = vld [vmem:[#allocation2 + $0x958] sm:$0xff]  ;;  %v853_v49 = vld [vmem:[#allocation2 + $0x940] sm:$0xff]  ;;  %v855_v50 = vld [vmem:[#allocation2 + $0x950] sm:$0xff] }
 0x331   :  { %974 = vmatpush1.bf16.msra.mxu0 %v825_v20  ;;  %1056 = vmatpush1.bf16.msra.mxu1 %v827_v21  ;;  %v858_v51 = vld [vmem:[#allocation2 + $0x968] sm:$0xff]  ;;  %v860_v52 = vld [vmem:[#allocation2 + $0x978] sm:$0xff]  ;;  %v857_v53 = vld [vmem:[#allocation2 + $0x960] sm:$0xff]  ;;  %v944_v21 = vpack.c.bf16 %v1566_v1, %v1566_v1 }
 0x332   :  { %975 = vmatprep.subr.bf16.mxu0 %v830_v3  ;;  %1057 = vmatprep.subr.bf16.mxu1 %v832_v22  ;;  %v859_v54 = vld [vmem:[#allocation2 + $0x970] sm:$0xff]  ;;  %v862_v55 = vld [vmem:[#allocation2 + $0x988] sm:$0xff]  ;;  %v864_v56 = vld [vmem:[#allocation2 + $0x998] sm:$0xff] }
 0x333   :  { %v861_v57 = vld [vmem:[#allocation2 + $0x980] sm:$0xff]  ;;  %v863_v58 = vld [vmem:[#allocation2 + $0x990] sm:$0xff]  ;;  %v866_v59 = vld [vmem:[#allocation2 + $0x9a8] sm:$0xff] }
 0x334   :  { %v868_v60 = vld [vmem:[#allocation2 + $0x9b8] sm:$0xff]  ;;  %v865_v63 = vld [vmem:[#allocation2 + $0x9a0] sm:$0xff]  ;;  %v867_v4 = vld [vmem:[#allocation2 + $0x9b0] sm:$0xff] }
 0x335   :  { %976 = vmatpush1.bf16.msra.mxu0 %v829_v23  ;;  %1058 = vmatpush1.bf16.msra.mxu1 %v831_v24  ;;  %v870_v5 = vld [vmem:[#allocation2 + $0x9c8] sm:$0xff]  ;;  %v872_v6 = vld [vmem:[#allocation2 + $0x9d8] sm:$0xff]  ;;  %v869_v7 = vld [vmem:[#allocation2 + $0x9c0] sm:$0xff] }
 0x336   :  { %977 = vmatprep.subr.bf16.mxu0 %v834_v25  ;;  %1059 = vmatprep.subr.bf16.mxu1 %v836_v26  ;;  %v871_v12 = vld [vmem:[#allocation2 + $0x9d0] sm:$0xff]  ;;  %v874_v8 = vld [vmem:[#allocation2 + $0x9e8] sm:$0xff]  ;;  %v876_v9 = vld [vmem:[#allocation2 + $0x9f8] sm:$0xff] }
 0x337   :  { %v873_v13 = vld [vmem:[#allocation2 + $0x9e0] sm:$0xff]  ;;  %v875_v16 = vld [vmem:[#allocation2 + $0x9f0] sm:$0xff]  ;;  %v878_v17 = vld [vmem:[#allocation2 + $0xa08] sm:$0xff] }
 0x338   :  { %v880_v10 = vld [vmem:[#allocation2 + $0xa18] sm:$0xff]  ;;  %v877_v0 = vld [vmem:[#allocation2 + $0xa00] sm:$0xff]  ;;  %v879_v18 = vld [vmem:[#allocation2 + $0xa10] sm:$0xff] }
 0x339   :  { %978 = vmatpush1.bf16.msra.mxu0 %v833_v27  ;;  %1060 = vmatpush1.bf16.msra.mxu1 %v835_v28  ;;  %v882_v19 = vld [vmem:[#allocation2 + $0xa28] sm:$0xff]  ;;  %v884_v20 = vld [vmem:[#allocation2 + $0xa38] sm:$0xff]  ;;  %v881_v3 = vld [vmem:[#allocation2 + $0xa20] sm:$0xff] }
 0x33a   :  { %979 = vmatprep.subr.bf16.mxu0 %v838_v29  ;;  %1061 = vmatprep.subr.bf16.mxu1 %v840_v30  ;;  %v883_v22 = vld [vmem:[#allocation2 + $0xa30] sm:$0xff]  ;;  %v886_v61 = vld [vmem:[#allocation2 + $0xa48] sm:$0xff]  ;;  %v888_v23 = vld [vmem:[#allocation2 + $0xa58] sm:$0xff] }
 0x33b   :  { %v885_v24 = vld [vmem:[#allocation2 + $0xa40] sm:$0xff]  ;;  %v887_v25 = vld [vmem:[#allocation2 + $0xa50] sm:$0xff]  ;;  %v890_v26 = vld [vmem:[#allocation2 + $0xa68] sm:$0xff] }
 0x33c   :  { %v892_v1 = vld [vmem:[#allocation2 + $0xa78] sm:$0xff]  ;;  %v889_v27 = vld [vmem:[#allocation2 + $0xa60] sm:$0xff]  ;;  %v891_v28 = vld [vmem:[#allocation2 + $0xa70] sm:$0xff] }
 0x33d   :  { %980 = vmatpush1.bf16.msra.mxu0 %v837_v31  ;;  %1062 = vmatpush1.bf16.msra.mxu1 %v839_v32  ;;  %v894_v29 = vld [vmem:[#allocation2 + $0xa88] sm:$0xff]  ;;  %v896_v30 = vld [vmem:[#allocation2 + $0xa98] sm:$0xff]  ;;  %v893_v31 = vld [vmem:[#allocation2 + $0xa80] sm:$0xff] }
 0x33e   :  { %981 = vmatprep.subr.bf16.mxu0 %v842_v33  ;;  %1063 = vmatprep.subr.bf16.mxu1 %v844_v34  ;;  %v895_v32 = vld [vmem:[#allocation2 + $0xa90] sm:$0xff]  ;;  %v898_v33 = vld [vmem:[#allocation2 + $0xaa8] sm:$0xff]  ;;  %v900_v34 = vld [vmem:[#allocation2 + $0xab8] sm:$0xff] }
 0x341   :  { %982 = vmatpush1.bf16.msra.mxu0 %v841_v35  ;;  %1064 = vmatpush1.bf16.msra.mxu1 %v843_v36  ;;  %v897_v35 = vld [vmem:[#allocation2 + $0xaa0] sm:$0xff]  ;;  %v899_v36 = vld [vmem:[#allocation2 + $0xab0] sm:$0xff] }
 0x342   :  { %983 = vmatprep.subr.bf16.mxu0 %v846_v37  ;;  %1065 = vmatprep.subr.bf16.mxu1 %v848_v40  ;;  %v902_v37 = vld [vmem:[#allocation2 + $0xac8] sm:$0xff]  ;;  %v904_v40 = vld [vmem:[#allocation2 + $0xad8] sm:$0xff] }
 0x345   :  { %984 = vmatpush1.bf16.msra.mxu0 %v845_v2  ;;  %1066 = vmatpush1.bf16.msra.mxu1 %v847_v15  ;;  %v901_v2 = vld [vmem:[#allocation2 + $0xac0] sm:$0xff]  ;;  %v903_v15 = vld [vmem:[#allocation2 + $0xad0] sm:$0xff] }
 0x346   :  { %985 = vmatprep.subr.bf16.mxu0 %v850_v43  ;;  %1067 = vmatprep.subr.bf16.mxu1 %v852_v44  ;;  %v906_v43 = vld [vmem:[#allocation2 + $0xae8] sm:$0xff]  ;;  %v908_v44 = vld [vmem:[#allocation2 + $0xaf8] sm:$0xff] }
 0x349   :  { %986 = vmatpush1.bf16.msra.mxu0 %v849_v45  ;;  %1068 = vmatpush1.bf16.msra.mxu1 %v851_v46  ;;  %v905_v45 = vld [vmem:[#allocation2 + $0xae0] sm:$0xff]  ;;  %v907_v46 = vld [vmem:[#allocation2 + $0xaf0] sm:$0xff] }
 0x34a   :  { %987 = vmatprep.subr.bf16.mxu0 %v854_v47  ;;  %1069 = vmatprep.subr.bf16.mxu1 %v856_v48  ;;  %v910_v47 = vld [vmem:[#allocation2 + $0xb08] sm:$0xff]  ;;  %v912_v48 = vld [vmem:[#allocation2 + $0xb18] sm:$0xff] }
 0x34d   :  { %988 = vmatpush1.bf16.msra.mxu0 %v853_v49  ;;  %1070 = vmatpush1.bf16.msra.mxu1 %v855_v50  ;;  %v909_v49 = vld [vmem:[#allocation2 + $0xb00] sm:$0xff]  ;;  %v911_v50 = vld [vmem:[#allocation2 + $0xb10] sm:$0xff] }
 0x34e   :  { %989 = vmatprep.subr.bf16.mxu0 %v858_v51  ;;  %1071 = vmatprep.subr.bf16.mxu1 %v860_v52  ;;  %v914_v51 = vld [vmem:[#allocation2 + $0xb28] sm:$0xff]  ;;  %v916_v52 = vld [vmem:[#allocation2 + $0xb38] sm:$0xff] }
 0x351   :  { %990 = vmatpush1.bf16.msra.mxu0 %v857_v53  ;;  %1072 = vmatpush1.bf16.msra.mxu1 %v859_v54  ;;  %v913_v53 = vld [vmem:[#allocation2 + $0xb20] sm:$0xff]  ;;  %v915_v54 = vld [vmem:[#allocation2 + $0xb30] sm:$0xff] }
 0x352   :  { %991 = vmatprep.subr.bf16.mxu0 %v862_v55  ;;  %1073 = vmatprep.subr.bf16.mxu1 %v864_v56  ;;  %v918_v55 = vld [vmem:[#allocation2 + $0xb48] sm:$0xff]  ;;  %v920_v56 = vld [vmem:[#allocation2 + $0xb58] sm:$0xff] }
 0x355   :  { %992 = vmatpush1.bf16.msra.mxu0 %v861_v57  ;;  %1074 = vmatpush1.bf16.msra.mxu1 %v863_v58  ;;  %v917_v57 = vld [vmem:[#allocation2 + $0xb40] sm:$0xff]  ;;  %v919_v58 = vld [vmem:[#allocation2 + $0xb50] sm:$0xff] }
 0x356   :  { %993 = vmatprep.subr.bf16.mxu0 %v866_v59  ;;  %1075 = vmatprep.subr.bf16.mxu1 %v868_v60  ;;  %v922_v59 = vld [vmem:[#allocation2 + $0xb68] sm:$0xff]  ;;  %v924_v60 = vld [vmem:[#allocation2 + $0xb78] sm:$0xff] }
 0x359   :  { %994 = vmatpush1.bf16.msra.mxu0 %v865_v63  ;;  %1076 = vmatpush1.bf16.msra.mxu1 %v867_v4  ;;  %v921_v63 = vld [vmem:[#allocation2 + $0xb60] sm:$0xff]  ;;  %v923_v4 = vld [vmem:[#allocation2 + $0xb70] sm:$0xff] }
 0x35a   :  { %995 = vmatprep.subr.bf16.mxu0 %v870_v5  ;;  %1077 = vmatprep.subr.bf16.mxu1 %v872_v6  ;;  %v926_v5 = vld [vmem:[#allocation2 + $0xb88] sm:$0xff]  ;;  %v928_v6 = vld [vmem:[#allocation2 + $0xb98] sm:$0xff] }
 0x35d   :  { %996 = vmatpush1.bf16.msra.mxu0 %v869_v7  ;;  %1078 = vmatpush1.bf16.msra.mxu1 %v871_v12  ;;  %v925_v7 = vld [vmem:[#allocation2 + $0xb80] sm:$0xff]  ;;  %v927_v12 = vld [vmem:[#allocation2 + $0xb90] sm:$0xff] }
 0x35e   :  { %997 = vmatprep.subr.bf16.mxu0 %v874_v8  ;;  %1079 = vmatprep.subr.bf16.mxu1 %v876_v9  ;;  %v930_v8 = vld [vmem:[#allocation2 + $0xba8] sm:$0xff]  ;;  %v932_v9 = vld [vmem:[#allocation2 + $0xbb8] sm:$0xff] }
 0x361   :  { %998 = vmatpush1.bf16.msra.mxu0 %v873_v13  ;;  %1080 = vmatpush1.bf16.msra.mxu1 %v875_v16  ;;  %v929_v13 = vld [vmem:[#allocation2 + $0xba0] sm:$0xff]  ;;  %v931_v16 = vld [vmem:[#allocation2 + $0xbb0] sm:$0xff] }
 0x362   :  { %1008 = vmatprep.subr.bf16.mxu0 %v878_v17  ;;  %1090 = vmatprep.subr.bf16.mxu1 %v880_v10  ;;  %v934_v17 = vld [vmem:[#allocation2 + $0xbc8] sm:$0xff]  ;;  %v936_v10 = vld [vmem:[#allocation2 + $0xbd8] sm:$0xff] }
 0x364   :  { %1000 = vmatmul.mubr.bf16.vlgmr.msra.gmra.mrb[8].mxu0 %v941_v11  ;;  %1082 = vmatmul.mubr.bf16.vlgmr.msra.gmra.mrb[8].mxu1 %v941_v11  ;;  %v933_v11 = vld [vmem:[#allocation2 + $0xbc0] sm:$0xff] }
 0x365   :  { %1009 = vmatpush1.bf16.msra.mxu0 %v877_v0  ;;  %1091 = vmatpush1.bf16.msra.mxu1 %v879_v18  ;;  %v935_v0 = vld [vmem:[#allocation2 + $0xbd0] sm:$0xff]  ;;  %v938_v18 = vld [vmem:[#allocation2 + $0xbe8] sm:$0xff] }
 0x366   :  { %1010 = vmatprep.subr.bf16.mxu0 %v882_v19  ;;  %1092 = vmatprep.subr.bf16.mxu1 %v884_v20  ;;  %v940_v19 = vld [vmem:[#allocation2 + $0xbf8] sm:$0xff]  ;;  %v937_v20 = vld [vmem:[#allocation2 + $0xbe0] sm:$0xff] }
 0x367   :  { %1040 = vmatprep.mubr.bf16.mxu0 %v944_v21  ;;  %1122 = vmatprep.mubr.bf16.mxu1 %v944_v21  ;;  %v939_v21 = vld [vmem:[#allocation2 + $0xbf0] sm:$0xff] }
 0x369   :  { %1011 = vmatpush1.bf16.msra.mxu0 %v881_v3  ;;  %1093 = vmatpush1.bf16.msra.mxu1 %v883_v22  ;;  %v943_v3 = vpack.c.bf16 %v1562_v62, %v1562_v62  ;;  %v945_v22 = vld [vmem:[#allocation10] sm:$0xf] }
 0x36a   :  { %1012 = vmatprep.subr.bf16.mxu0 %v886_v61  ;;  %1094 = vmatprep.subr.bf16.mxu1 %v888_v23  ;;  %v950_v61 = vrot.slane %v945_v22, %v621_v38  ;;  %v958_v23 = vrot.slane %v945_v22, %v629_v39  ;;  %v1137_v39 = vld [vmem:[#allocation7 + $0x10] sm:$0xff] }
 0x36d   :  { %1013 = vmatpush1.bf16.msra.mxu0 %v885_v24  ;;  %1095 = vmatpush1.bf16.msra.mxu1 %v887_v25  ;;  %v954_v24 = vrot.slane %v945_v22, %v625_v41  ;;  %v962_v25 = vrot.slane %v945_v22, %v633_v42 }
 0x36e   :  { %1014 = vmatprep.subr.bf16.mxu0 %v890_v26  ;;  %1096 = vmatprep.subr.bf16.mxu1 %v892_v1 }
 0x371   :  { %1015 = vmatpush1.bf16.msra.mxu0 %v889_v27  ;;  %1097 = vmatpush1.bf16.msra.mxu1 %v891_v28 }
 0x372   :  { %1016 = vmatprep.subr.bf16.mxu0 %v894_v29  ;;  %1098 = vmatprep.subr.bf16.mxu1 %v896_v30  ;;  %v1135_v30 = vld [vmem:[#allocation7] sm:$0xff] }
 0x375   :  { %1017 = vmatpush1.bf16.msra.mxu0 %v893_v31  ;;  %1099 = vmatpush1.bf16.msra.mxu1 %v895_v32 }
 0x376   :  { %1018 = vmatprep.subr.bf16.mxu0 %v898_v33  ;;  %1100 = vmatprep.subr.bf16.mxu1 %v900_v34 }
 0x379   :  { %1019 = vmatpush1.bf16.msra.mxu0 %v897_v35  ;;  %1101 = vmatpush1.bf16.msra.mxu1 %v899_v36  ;;  %v1136_v36 = vld [vmem:[#allocation7 + $0x8] sm:$0xff] }
 0x37a   :  { %1020 = vmatprep.subr.bf16.mxu0 %v902_v37  ;;  %1102 = vmatprep.subr.bf16.mxu1 %v904_v40 }
 0x37d   :  { %1021 = vmatpush1.bf16.msra.mxu0 %v901_v2  ;;  %1103 = vmatpush1.bf16.msra.mxu1 %v903_v15  ;;  %v1138_v2 = vld [vmem:[#allocation7 + $0x18] sm:$0xff] }
 0x37e   :  { %1022 = vmatprep.subr.bf16.mxu0 %v906_v43  ;;  %1104 = vmatprep.subr.bf16.mxu1 %v908_v44 }
 0x381   :  { %1023 = vmatpush1.bf16.msra.mxu0 %v905_v45  ;;  %1105 = vmatpush1.bf16.msra.mxu1 %v907_v46 }
 0x382   :  { %1024 = vmatprep.subr.bf16.mxu0 %v910_v47  ;;  %1106 = vmatprep.subr.bf16.mxu1 %v912_v48 }
 0x385   :  { %1025 = vmatpush1.bf16.msra.mxu0 %v909_v49  ;;  %1107 = vmatpush1.bf16.msra.mxu1 %v911_v50 }
 0x386   :  { %1026 = vmatprep.subr.bf16.mxu0 %v914_v51  ;;  %1108 = vmatprep.subr.bf16.mxu1 %v916_v52 }
 0x389   :  { %1027 = vmatpush1.bf16.msra.mxu0 %v913_v53  ;;  %1109 = vmatpush1.bf16.msra.mxu1 %v915_v54 }
 0x38a   :  { %1028 = vmatprep.subr.bf16.mxu0 %v918_v55  ;;  %1110 = vmatprep.subr.bf16.mxu1 %v920_v56 }
 0x38d   :  { %1029 = vmatpush1.bf16.msra.mxu0 %v917_v57  ;;  %1111 = vmatpush1.bf16.msra.mxu1 %v919_v58 }
 0x38e   :  { %1030 = vmatprep.subr.bf16.mxu0 %v922_v59  ;;  %1112 = vmatprep.subr.bf16.mxu1 %v924_v60 }
 0x391   :  { %1031 = vmatpush1.bf16.msra.mxu0 %v921_v63  ;;  %1113 = vmatpush1.bf16.msra.mxu1 %v923_v4 }
 0x392   :  { %1032 = vmatprep.subr.bf16.mxu0 %v926_v5  ;;  %1114 = vmatprep.subr.bf16.mxu1 %v928_v6 }
 0x395   :  { %1033 = vmatpush1.bf16.msra.mxu0 %v925_v7  ;;  %1115 = vmatpush1.bf16.msra.mxu1 %v927_v12 }
 0x396   :  { %1034 = vmatprep.subr.bf16.mxu0 %v930_v8  ;;  %1116 = vmatprep.subr.bf16.mxu1 %v932_v9 }
 0x399   :  { %1035 = vmatpush1.bf16.msra.mxu0 %v929_v13  ;;  %1117 = vmatpush1.bf16.msra.mxu1 %v931_v16 }
 0x39a   :  { %1036 = vmatprep.subr.bf16.mxu0 %v934_v17  ;;  %1118 = vmatprep.subr.bf16.mxu1 %v936_v10 }
 0x39d   :  { %1037 = vmatpush1.bf16.msra.mxu0 %v933_v11  ;;  %1119 = vmatpush1.bf16.msra.mxu1 %v935_v0 }
 0x39e   :  { %1038 = vmatprep.subr.bf16.mxu0 %v938_v18  ;;  %1120 = vmatprep.subr.bf16.mxu1 %v940_v19 }
 0x3a1   :  { %1039 = vmatpush1.bf16.msra.mxu0 %v937_v20  ;;  %1121 = vmatpush1.bf16.msra.mxu1 %v939_v21 }
 0x3a4   :  { %1041 = vmatmul.mubr.bf16.vlgmr.msra.gmra.mrb[8].mxu0 %v943_v3  ;;  %1123 = vmatmul.mubr.bf16.vlgmr.msra.gmra.mrb[8].mxu1 %v943_v3 }
 0x477   :  { %v1042_v26 = vpop.f32.mrb[8].mxu0  ;;  %v1124_v1 = vpop.f32.mrb[8].mxu1 }
 0x478   :  { %v1210_v62 = vadd.f32 %v1042_v26, %v950_v61  ;;  %v1212_v27 = vadd.f32 %v1124_v1, %v958_v23  ;;  %v1044_v28 = vpop.f32.mrb[9].mxu0  ;;  %v1126_v29 = vpop.f32.mrb[9].mxu1 }
 0x479   :  { %v1211_v31 = vadd.f32 %v1044_v28, %v954_v24  ;;  %v1213_v32 = vadd.f32 %v1126_v29, %v962_v25  ;;  %v1046_v33 = vpop.f32.mrb[10].mxu0  ;;  %v1128_v38 = vpop.f32.mrb[10].mxu1 }
 0x47a   :  { %v1131_v34 = vmax.f32 %v1210_v62, 0.0  ;;  %v1133_v35 = vmax.f32 %v1212_v27, 0.0  ;;  %v1047_v37 = vpop.f32.mrb[11].mxu0  ;;  %v1129_v41 = vpop.f32.mrb[11].mxu1 }
 0x47b   :  { %v1132_v40 = vmax.f32 %v1211_v31, 0.0  ;;  %v1134_v14 = vmax.f32 %v1213_v32, 0.0 }
 0x47c   :  { %v1139_v42 = vsub.f32 %v1131_v34, %v1135_v30  ;;  %v1141_v15 = vsub.f32 %v1133_v35, %v1137_v39 }
 0x47d   :  { %v1140_v43 = vsub.f32 %v1132_v40, %v1136_v36  ;;  %v1142_v46 = vsub.f32 %v1134_v14, %v1138_v2 }
 0x47e   :  { %v1143_v44 = vmul.f32 %v1139_v42, %v1139_v42  ;;  %v1145_v47 = vmul.f32 %v1141_v15, %v1141_v15 }
 0x47f   :  { %v1144_v45 = vmul.f32 %v1140_v43, %v1140_v43  ;;  %v1146_v49 = vmul.f32 %v1142_v46, %v1142_v46 }
 0x481   :  { %v1147_v48 = vadd.f32 %v1144_v45, %v1143_v44 }
 0x483   :  { %v1148_v50 = vadd.f32 %v1147_v48, %v1145_v47 }
 0x485   :  { %v1149_v51 = vadd.f32 %v1148_v50, %v1146_v49 }
 0x487   :  { %1150 = vadd.xlane.f32.xlu0 %v1149_v51 }
 0x514   :  { %v1151_v52 = vpop.xlane.xlu0 %1150 }
 0x515   :  { %v1152_v53 = vrot.slane %v1151_v52, 4 }
 0x517   :  { %v1153_v54 = vadd.f32 %v1152_v53, %v1151_v52 }
 0x519   :  { %v1154_v55 = vrot.slane %v1153_v54, 2 }
 0x51b   :  { %v1155_v56 = vadd.f32 %v1154_v55, %v1153_v54 }
 0x51d   :  { %v1156_v57 = vrot.slane %v1155_v56, 1 }
 0x51f   :  { %v1157_v58 = vadd.f32 %v1156_v57, %v1155_v56 }
 0x521   :  { %1238 = vpush %v1157_v58 }
 0x552   :  { %s1239_s4 = spop %1238 }
 0x553   :  { %1160 = sst [smem:[#allocation12]] %s1239_s4 }
 0x554   :  { %1357 = shalt.err (!%p1354_p6)
}
 0x555   :  { %s1391_s18 = smov [#allocation12]  }
 0x556   :  { %1168 = dma.smem_to_hbm %s1391_s18, 16, %s1599_s5, [#allocation6]  }
 0x557   :  { %1370 = dma.done.wait [#allocation6], 16  }
 0x558   :  { %1371 = vsyncadd [#allocation6], 4294967280 }
 0x559   :  { %1172 = sfence }
 0x55a   :  { %1173 = vsyncpa [#allocation5], 1 }
 0x55b   :  { %1174 = vsyncpa [#allocation8], 1 }
 0x55c   :  { %1175 = vsyncpa [#allocation11], 1 }
 0x55d   :  { %1176 = vsyncpa [#allocation6], 1 }
 0x55e   :  { %1177 = vsyncmov [#allocation3] }
 0x561   :  { %s1178_s22 = vpop.sfrf %1177 }
 0x562   :  { %p1203_p7 = scmp.ne.s32.totalorder %s1178_s22, 0 }
 0x564   :  { %1182 = shalt.err (%p1203_p7)  }
 0x565   :  { %1184 = vsyncmov [#allocation3 + $0x1] }
 0x568   :  { %s1185_s23 = vpop.sfrf %1184 }
 0x569   :  { %p1204_p8 = scmp.ne.s32.totalorder %s1185_s23, 0 }
 0x56b   :  { %1189 = shalt.err (%p1204_p8)  }
 0x56c   :  { %1191 = vsyncmov [#allocation3 + $0x2] }
 0x56f   :  { %s1192_s24 = vpop.sfrf %1191 }
 0x570   :  { %p1205_p9 = scmp.ne.s32.totalorder %s1192_s24, 0 }
 0x572   :  { %1196 = shalt.err (%p1205_p9)  }

</bundles_post_ra>
